<compile_context>
chip_gen: v7x
topology: tpu7x:2x2x1
jax: 0.10.0
libtpu: 0.0.40
codegen_flags: <defaults>
</compile_context>

<pallas_src>
import functools
import math

import jax
import jax.numpy as jnp
from jax.experimental import pallas as pl
from jax.experimental.pallas import tpu as pltpu

# Large-negative mask value: numerically equivalent to torch's -inf here
# (exp underflows to exactly 0) while avoiding -inf arithmetic in the kernel.
MASK_VALUE = -1e30


# --------------------------- Pallas kernel ---------------------------
def multihead_sdpa_kernel(q_ref, k_ref, v_ref, wq_ref, wk_ref, wv_ref,
                          wo_ref, bo_ref, o_ref,
                          *, heads, masking, compute_dtype):
    cd = compute_dtype
    f32 = jnp.float32
    TB, Lq, dk = q_ref.shape
    _, Lk, _ = k_ref.shape
    dv = v_ref.shape[-1]
    dkh = dk // heads
    dvh = dv // heads
    scale = 1.0 / math.sqrt(dkh)          # python float, identical in ref

    exact = (cd == jnp.float32)
    dot_kwargs = dict(preferred_element_type=f32)
    if exact:
        # Pin full f32 MXU precision so the f32 path is a true correctness path
        # regardless of backend defaults.
        dot_kwargs["precision"] = jax.lax.Precision.HIGHEST

    # Input projections: flatten (TB, L, D) -> (TB*L, D) so each matmul sees a
    # tall M dimension (row-wise independent, so batching is exact).
    q2 = q_ref[...].reshape(TB * Lq, dk).astype(cd)
    k2 = k_ref[...].reshape(TB * Lk, dk).astype(cd)
    v2 = v_ref[...].reshape(TB * Lk, dv).astype(cd)
    qp = jnp.dot(q2, wq_ref[...].astype(cd), **dot_kwargs).reshape(TB, Lq, dk)
    kp = jnp.dot(k2, wk_ref[...].astype(cd), **dot_kwargs).reshape(TB, Lk, dk)
    vp = jnp.dot(v2, wv_ref[...].astype(cd), **dot_kwargs).reshape(TB, Lk, dv)

    if masking:  # static flag -> compiled in/out
        qi = jax.lax.broadcasted_iota(jnp.int32, (Lq, Lk), 0)   # query index
        ki = jax.lax.broadcasted_iota(jnp.int32, (Lq, Lk), 1)   # key index
        mask = jnp.where(ki <= qi, 0.0, MASK_VALUE).astype(f32)

    # Hoisted once (not re-broadcast per head).
    wo = wo_ref[...].astype(cd)            # (dv, dv)
    bo = bo_ref[...].astype(f32)           # (1, dv)

    # Per-head attention; WO applied per head and accumulated, which fuses the
    # lane-axis head concat into the output matmul.
    acc = jnp.zeros((TB * Lq, dv), f32)
    for h in range(heads):                 # heads is small & static -> unrolled
        qh = qp[:, :, h * dkh:(h + 1) * dkh].astype(cd)   # (TB, Lq, dkh)
        kh = kp[:, :, h * dkh:(h + 1) * dkh].astype(cd)   # (TB, Lk, dkh)
        vh = vp[:, :, h * dvh:(h + 1) * dvh].astype(cd)   # (TB, Lk, dvh)

        s = jnp.einsum("bqd,bkd->bqk", qh, kh, **dot_kwargs) * scale
        if masking:
            s = s + mask[None]
        # torch: F.softmax(y, dim=1)  ==> normalize over the QUERY axis.
        s = s - jnp.max(s, axis=1, keepdims=True)
        e = jnp.exp(s)                                       # f32 elementwise
        denom = jnp.sum(e, axis=1, keepdims=True)
        if exact:
            p = e / denom
        else:
            p = e * pl.reciprocal(denom, approx=True)        # EUP slot, ~free

        hout = jnp.einsum("bqk,bkd->bqd", p.astype(cd), vh,
                          **dot_kwargs)                      # (TB, Lq, dvh)
        acc = acc + jnp.dot(hout.reshape(TB * Lq, dvh).astype(cd),
                            wo[h * dvh:(h + 1) * dvh, :], **dot_kwargs)

    out = acc + bo
    o_ref[...] = out.reshape(TB, Lq, dv).astype(o_ref.dtype)


# --------------------------- wrapper ---------------------------
def multihead_sdpa_pallas(keys, queries, values, params, heads, *,
                          masking=False, compute_dtype=jnp.bfloat16,
                          batch_tile=None):
    B, Lq, dk = queries.shape
    Bk, Lk, dk2 = keys.shape
    Bv, Lkv, dv = values.shape
    assert B == Bk == Bv and dk == dk2 and Lk == Lkv
    assert dk % heads == 0 and dv % heads == 0

    if batch_tile is None:
        batch_tile = 8
        while B % batch_tile:
            batch_tile -= 1
    TB = batch_tile
    assert B % TB == 0
    grid = (B // TB,)

    # MXU weights stored in the compute dtype at the call boundary (halves
    # weight DMA/VMEM in bf16 mode); bias stays f32.
    wq = params["wq"].astype(compute_dtype)
    wk = params["wk"].astype(compute_dtype)
    wv = params["wv"].astype(compute_dtype)
    wo = params["wo"].astype(compute_dtype)
    bo = params["bo"].astype(jnp.float32)

    def batched(shape):
        return pl.BlockSpec(shape, lambda b: (b, 0, 0))

    def full(shape):
        n = len(shape)
        return pl.BlockSpec(shape, lambda b: (0,) * n)

    in_specs = [
        batched((TB, Lq, dk)),   # queries
        batched((TB, Lk, dk)),   # keys
        batched((TB, Lk, dv)),   # values
        # TODO(synk): for large dk/dv on v7x, single-buffer these constant-index
        # weight specs (pipeline_mode=pl.Buffered(1)) and/or tile dv over an
        # extra "arbitrary" grid axis with a VMEM accumulator.
        full((dk, dk)),          # wq (heads packed column-wise)
        full((dk, dk)),          # wk
        full((dv, dv)),          # wv
        full((dv, dv)),          # wo
        full((1, dv)),           # bo
    ]
    out_spec = batched((TB, Lq, dv))

    # Explicit scoped-VMEM budget: weights + double-buffered activation tiles
    # plus headroom, clamped to [32 MiB, 64 MiB] (v7x physical VMEM is 64 MiB).
    wbytes = sum(int(w.size) * w.dtype.itemsize for w in (wq, wk, wv, wo, bo))
    abytes = 4 * TB * (Lq * dk + Lk * dk + Lk * dv + Lq * dv)
    vmem_limit = int(min(64 << 20, max(32 << 20, 2 * (wbytes + abytes) + (8 << 20))))

    kernel = functools.partial(multihead_sdpa_kernel, heads=heads,
                               masking=masking, compute_dtype=compute_dtype)
    return pl.pallas_call(
        kernel,
        out_shape=jax.ShapeDtypeStruct((B, Lq, dv), jnp.float32),
        grid=grid,
        in_specs=in_specs,
        out_specs=out_spec,
        compiler_params=pltpu.CompilerParams(
            dimension_semantics=("parallel",),
            vmem_limit_bytes=vmem_limit),
    )(queries, keys, values, wq, wk, wv, wo, bo)


# --------------- pure-JAX reference (same math) for self-check ---------------
def ref_multihead_sdpa(keys, queries, values, params, heads, *, masking=False,
                       compute_dtype=jnp.float32):
    """Replica of MultiHeadSDPAttentionBlock.forward. `compute_dtype` mirrors
    the kernel's MXU operand precision (operands cast, f32 accumulation).
    All matmuls pinned to Precision.HIGHEST so backend defaults don't skew
    the comparison."""
    f32 = jnp.float32
    prec = jax.lax.Precision.HIGHEST
    if compute_dtype == jnp.float32:
        c = lambda x: x.astype(f32)
    else:
        c = lambda x: x.astype(compute_dtype).astype(f32)
    _, Lq, dk = queries.shape
    _, Lk, dv = values.shape
    dkh, dvh = dk // heads, dv // heads
    scale = 1.0 / math.sqrt(dkh)
    head_outs = []
    for h in range(heads):
        wq_h = params["wq"][:, h * dkh:(h + 1) * dkh]
        wk_h = params["wk"][:, h * dkh:(h + 1) * dkh]
        wv_h = params["wv"][:, h * dvh:(h + 1) * dvh]
        Q_ = jnp.einsum("bld,df->blf", c(queries), c(wq_h), precision=prec)
        K_ = jnp.einsum("bld,df->blf", c(keys), c(wk_h), precision=prec)
        V_ = jnp.einsum("bld,df->blf", c(values), c(wv_h), precision=prec)
        y = jnp.einsum("bqd,bkd->bqk", c(Q_), c(K_), precision=prec) * scale
        if masking:
            qi = jnp.arange(Lq)[:, None]
            ki = jnp.arange(Lk)[None, :]
            y = y + jnp.where(ki <= qi, 0.0, MASK_VALUE)
        z = jax.nn.softmax(y, axis=1)          # torch F.softmax(y, dim=1)
        head_outs.append(jnp.einsum("bqk,bkd->bqd", c(z), c(V_), precision=prec))
    out = jnp.concatenate(head_outs, axis=-1)  # (B, Lq, dv)
    return (jnp.einsum("bqd,de->bqe", c(out), c(params["wo"]), precision=prec)
            + params["bo"])


# --------------------------- deterministic init ---------------------------
def init_params(key, dk, dv, heads):
    """Per-head WQ/WK/WV (no bias) packed column-wise into (dk,dk)/(dk,dk)/(dv,dv)
    plus shared WO (dv,dv) with bias. Weights are (in_features, out_features)
    so y = x @ W + b (equivalent to torch's x @ W_t.T + b)."""
    del heads  # packing is implicit in the column layout
    ks = jax.random.split(key, 5)
    sk = 1.0 / jnp.sqrt(jnp.float32(dk))
    sv = 1.0 / jnp.sqrt(jnp.float32(dv))
    return {
        "wq": jax.random.normal(ks[0], (dk, dk), jnp.float32) * sk,
        "wk": jax.random.normal(ks[1], (dk, dk), jnp.float32) * sk,
        "wv": jax.random.normal(ks[2], (dv, dv), jnp.float32) * sv,
        "wo": jax.random.normal(ks[3], (dv, dv), jnp.float32) * sv,
        "bo": jax.random.normal(ks[4], (1, dv), jnp.float32) * 0.02,
    }


def _rel_err(out, ref):
    out = jnp.asarray(out, jnp.float32)
    ref = jnp.asarray(ref, jnp.float32)
    return float(jnp.max(jnp.abs(out - ref)) / (jnp.max(jnp.abs(ref)) + 1e-12))


if __name__ == "__main__":
    # Small shapes consistent with the module: dk != dv, Lq != Lk allowed.
    B, LQ, LK, DK, DV, HEADS = 4, 8, 16, 32, 64, 2

    root = jax.random.PRNGKey(0)
    k_k, k_q, k_v, k_p = jax.random.split(root, 4)
    keys_x = jax.random.normal(k_k, (B, LK, DK), jnp.float32)
    queries_x = jax.random.normal(k_q, (B, LQ, DK), jnp.float32)
    values_x = jax.random.normal(k_v, (B, LK, DV), jnp.float32)
    params = init_params(k_p, DK, DV, HEADS)

    # 1) exact-semantics check: f32 MXU path vs pure-JAX reference (both pinned
    #    to HIGHEST matmul precision).
    out_f32 = jax.block_until_ready(
        multihead_sdpa_pallas(keys_x, queries_x, values_x, params, HEADS,
                              compute_dtype=jnp.float32, batch_tile=2))
    ref_f32 = ref_multihead_sdpa(keys_x, queries_x, values_x, params, HEADS)
    assert out_f32.shape == (B, LQ, DV)
    e1 = _rel_err(out_f32, ref_f32)
    assert e1 < 1e-2, f"f32 path mismatch (rel err {e1})"

    # 2) optimized bf16-MXU path vs precision-mirrored reference.
    out_bf16 = jax.block_until_ready(
        multihead_sdpa_pallas(keys_x, queries_x, values_x, params, HEADS,
                              compute_dtype=jnp.bfloat16, batch_tile=2))
    ref_bf16 = ref_multihead_sdpa(keys_x, queries_x, values_x, params, HEADS,
                                  compute_dtype=jnp.bfloat16)
    e2 = _rel_err(out_bf16, ref_bf16)
    assert e2 < 3e-2, f"bf16 path mismatch (rel err {e2})"

    # 3) causal-masking path (masking=True); square Lq == Lk so no fully-masked
    #    softmax column (torch would produce NaN for those, as would we).
    keys_m = jax.random.normal(jax.random.fold_in(root, 1), (B, LQ, DK), jnp.float32)
    values_m = jax.random.normal(jax.random.fold_in(root, 2), (B, LQ, DV), jnp.float32)
    out_m = jax.block_until_ready(
        multihead_sdpa_pallas(keys_m, queries_x, values_m, params, HEADS,
                              masking=True, compute_dtype=jnp.float32, batch_tile=2))
    ref_m = ref_multihead_sdpa(keys_m, queries_x, values_m, params, HEADS, masking=True)
    e3 = _rel_err(out_m, ref_m)
    assert e3 < 1e-2, f"masked path mismatch (rel err {e3})"

    print("KERNEL_OK")
</pallas_src>

<mosaic_0001>
module attributes {stable_mosaic.version = 11 : i64} {
  func.func @multihead_sdpa_kernel(%arg0: i32, %arg1: memref<2x8x32xf32, #tpu.memory_space<vmem>>, %arg2: memref<2x16x32xf32, #tpu.memory_space<vmem>>, %arg3: memref<2x16x64xf32, #tpu.memory_space<vmem>>, %arg4: memref<32x32xf32, #tpu.memory_space<vmem>>, %arg5: memref<32x32xf32, #tpu.memory_space<vmem>>, %arg6: memref<64x64xf32, #tpu.memory_space<vmem>>, %arg7: memref<64x64xf32, #tpu.memory_space<vmem>>, %arg8: memref<1x64xf32, #tpu.memory_space<vmem>>, %arg9: memref<2x8x64xf32, #tpu.memory_space<vmem>>) attributes {dimension_semantics = [#tpu.dimension_semantics<parallel>], iteration_bounds = array<i64: 2>, scalar_prefetch = 0 : i64, scratch_operands = 0 : i64, tpu.core_type = #tpu.core_type<tc>, window_params = [{transform_indices = @transform_0, window_bounds = array<i64: 2, 8, 32>}, {transform_indices = @transform_1, window_bounds = array<i64: 2, 16, 32>}, {transform_indices = @transform_2, window_bounds = array<i64: 2, 16, 64>}, {pipeline_mode = #tpu.pipeline_mode<synchronous>, transform_indices = @transform_3, window_bounds = array<i64: 32, 32>}, {pipeline_mode = #tpu.pipeline_mode<synchronous>, transform_indices = @transform_4, window_bounds = array<i64: 32, 32>}, {pipeline_mode = #tpu.pipeline_mode<synchronous>, transform_indices = @transform_5, window_bounds = array<i64: 64, 64>}, {pipeline_mode = #tpu.pipeline_mode<synchronous>, transform_indices = @transform_6, window_bounds = array<i64: 64, 64>}, {pipeline_mode = #tpu.pipeline_mode<synchronous>, transform_indices = @transform_7, window_bounds = array<i64: 1, 64>}, {transform_indices = @transform_8, window_bounds = array<i64: 2, 8, 64>}]} {
    %c0 = arith.constant 0 : index
    %c0_0 = arith.constant 0 : index
    %c0_1 = arith.constant 0 : index
    %0 = vector.load %arg1[%c0, %c0_0, %c0_1] : memref<2x8x32xf32, #tpu.memory_space<vmem>>, vector<2x8x32xf32>
    %1 = vector.shape_cast %0 : vector<2x8x32xf32> to vector<16x32xf32>
    %c0_2 = arith.constant 0 : index
    %c0_3 = arith.constant 0 : index
    %c0_4 = arith.constant 0 : index
    %2 = vector.load %arg2[%c0_2, %c0_3, %c0_4] : memref<2x16x32xf32, #tpu.memory_space<vmem>>, vector<2x16x32xf32>
    %3 = vector.shape_cast %2 : vector<2x16x32xf32> to vector<32x32xf32>
    %c0_5 = arith.constant 0 : index
    %c0_6 = arith.constant 0 : index
    %c0_7 = arith.constant 0 : index
    %4 = vector.load %arg3[%c0_5, %c0_6, %c0_7] : memref<2x16x64xf32, #tpu.memory_space<vmem>>, vector<2x16x64xf32>
    %5 = vector.shape_cast %4 : vector<2x16x64xf32> to vector<32x64xf32>
    %c0_8 = arith.constant 0 : index
    %c0_9 = arith.constant 0 : index
    %6 = vector.load %arg4[%c0_8, %c0_9] : memref<32x32xf32, #tpu.memory_space<vmem>>, vector<32x32xf32>
    %cst = arith.constant dense<0.000000e+00> : vector<16x32xf32>
    %7 = tpu.matmul %1, %6, %cst {dimension_numbers = #tpu.dot_dimension_numbers<[1], [0], [0], [1], [0, 0, 1, 1], [], []>, precision = #tpu.contract_precision<fp32>} : vector<16x32xf32>, vector<32x32xf32>, vector<16x32xf32> -> vector<16x32xf32>
    %8 = vector.shape_cast %7 : vector<16x32xf32> to vector<2x8x32xf32>
    %c0_10 = arith.constant 0 : index
    %c0_11 = arith.constant 0 : index
    %9 = vector.load %arg5[%c0_10, %c0_11] : memref<32x32xf32, #tpu.memory_space<vmem>>, vector<32x32xf32>
    %cst_12 = arith.constant dense<0.000000e+00> : vector<32x32xf32>
    %10 = tpu.matmul %3, %9, %cst_12 {dimension_numbers = #tpu.dot_dimension_numbers<[1], [0], [0], [1], [0, 0, 1, 1], [], []>, precision = #tpu.contract_precision<fp32>} : vector<32x32xf32>, vector<32x32xf32>, vector<32x32xf32> -> vector<32x32xf32>
    %11 = vector.shape_cast %10 : vector<32x32xf32> to vector<2x16x32xf32>
    %c0_13 = arith.constant 0 : index
    %c0_14 = arith.constant 0 : index
    %12 = vector.load %arg6[%c0_13, %c0_14] : memref<64x64xf32, #tpu.memory_space<vmem>>, vector<64x64xf32>
    %cst_15 = arith.constant dense<0.000000e+00> : vector<32x64xf32>
    %13 = tpu.matmul %5, %12, %cst_15 {dimension_numbers = #tpu.dot_dimension_numbers<[1], [0], [0], [1], [0, 0, 1, 1], [], []>, precision = #tpu.contract_precision<fp32>} : vector<32x64xf32>, vector<64x64xf32>, vector<32x64xf32> -> vector<32x64xf32>
    %14 = vector.shape_cast %13 : vector<32x64xf32> to vector<2x16x64xf32>
    %c0_16 = arith.constant 0 : index
    %c0_17 = arith.constant 0 : index
    %15 = vector.load %arg7[%c0_16, %c0_17] : memref<64x64xf32, #tpu.memory_space<vmem>>, vector<64x64xf32>
    %c0_18 = arith.constant 0 : index
    %c0_19 = arith.constant 0 : index
    %16 = vector.load %arg8[%c0_18, %c0_19] : memref<1x64xf32, #tpu.memory_space<vmem>>, vector<1x64xf32>
    %cst_20 = arith.constant 0.000000e+00 : f32
    %17 = vector.broadcast %cst_20 : f32 to vector<16x64xf32>
    %18 = vector.extract_strided_slice %8 {offsets = [0, 0, 0], sizes = [2, 8, 16], strides = [1, 1, 1]} : vector<2x8x32xf32> to vector<2x8x16xf32>
    %19 = vector.extract_strided_slice %11 {offsets = [0, 0, 0], sizes = [2, 16, 16], strides = [1, 1, 1]} : vector<2x16x32xf32> to vector<2x16x16xf32>
    %20 = vector.extract_strided_slice %14 {offsets = [0, 0, 0], sizes = [2, 16, 32], strides = [1, 1, 1]} : vector<2x16x64xf32> to vector<2x16x32xf32>
    "tpu.trace_start"() <{level = 10 : i32, message = "bqd,bkd->bqk"}> : () -> ()
    %cst_21 = arith.constant dense<0.000000e+00> : vector<2x8x16xf32>
    %21 = tpu.matmul %18, %19, %cst_21 {dimension_numbers = #tpu.dot_dimension_numbers<[2], [2], [1], [1], [0, 0, 0, 1, 1, 1], [0], [0]>, precision = #tpu.contract_precision<fp32>} : vector<2x8x16xf32>, vector<2x16x16xf32>, vector<2x8x16xf32> -> vector<2x8x16xf32>
    "tpu.trace_stop"() : () -> ()
    %cst_22 = arith.constant 2.500000e-01 : f32
    %22 = vector.broadcast %cst_22 : f32 to vector<2x8x16xf32>
    %23 = arith.mulf %21, %22 : vector<2x8x16xf32>
    %cst_23 = arith.constant dense<0xFF800000> : vector<2x16xf32>
    %24 = vector.multi_reduction <maximumf>, %23, %cst_23 [1] : vector<2x8x16xf32> to vector<2x16xf32>
    %25 = vector.shape_cast %24 : vector<2x16xf32> to vector<2x1x16xf32>
    %26 = vector.broadcast %25 : vector<2x1x16xf32> to vector<2x8x16xf32>
    %27 = arith.subf %23, %26 : vector<2x8x16xf32>
    %28 = math.exp %27 : vector<2x8x16xf32>
    %cst_24 = arith.constant dense<0.000000e+00> : vector<2x16xf32>
    %29 = vector.multi_reduction <add>, %28, %cst_24 [1] : vector<2x8x16xf32> to vector<2x16xf32>
    %30 = vector.shape_cast %29 : vector<2x16xf32> to vector<2x1x16xf32>
    %31 = vector.broadcast %30 : vector<2x1x16xf32> to vector<2x8x16xf32>
    %32 = arith.divf %28, %31 : vector<2x8x16xf32>
    "tpu.trace_start"() <{level = 10 : i32, message = "bqk,bkd->bqd"}> : () -> ()
    %cst_25 = arith.constant dense<0.000000e+00> : vector<2x8x32xf32>
    %33 = tpu.matmul %32, %20, %cst_25 {dimension_numbers = #tpu.dot_dimension_numbers<[2], [1], [1], [2], [0, 0, 0, 1, 1, 2], [0], [0]>, precision = #tpu.contract_precision<fp32>} : vector<2x8x16xf32>, vector<2x16x32xf32>, vector<2x8x32xf32> -> vector<2x8x32xf32>
    "tpu.trace_stop"() : () -> ()
    %34 = vector.shape_cast %33 : vector<2x8x32xf32> to vector<16x32xf32>
    %35 = vector.extract_strided_slice %15 {offsets = [0, 0], sizes = [32, 64], strides = [1, 1]} : vector<64x64xf32> to vector<32x64xf32>
    %cst_26 = arith.constant dense<0.000000e+00> : vector<16x64xf32>
    %36 = tpu.matmul %34, %35, %cst_26 {dimension_numbers = #tpu.dot_dimension_numbers<[1], [0], [0], [1], [0, 0, 1, 1], [], []>, precision = #tpu.contract_precision<fp32>} : vector<16x32xf32>, vector<32x64xf32>, vector<16x64xf32> -> vector<16x64xf32>
    %37 = arith.addf %17, %36 : vector<16x64xf32>
    %38 = vector.extract_strided_slice %8 {offsets = [0, 0, 16], sizes = [2, 8, 16], strides = [1, 1, 1]} : vector<2x8x32xf32> to vector<2x8x16xf32>
    %39 = vector.extract_strided_slice %11 {offsets = [0, 0, 16], sizes = [2, 16, 16], strides = [1, 1, 1]} : vector<2x16x32xf32> to vector<2x16x16xf32>
    %40 = vector.extract_strided_slice %14 {offsets = [0, 0, 32], sizes = [2, 16, 32], strides = [1, 1, 1]} : vector<2x16x64xf32> to vector<2x16x32xf32>
    "tpu.trace_start"() <{level = 10 : i32, message = "bqd,bkd->bqk"}> : () -> ()
    %cst_27 = arith.constant dense<0.000000e+00> : vector<2x8x16xf32>
    %41 = tpu.matmul %38, %39, %cst_27 {dimension_numbers = #tpu.dot_dimension_numbers<[2], [2], [1], [1], [0, 0, 0, 1, 1, 1], [0], [0]>, precision = #tpu.contract_precision<fp32>} : vector<2x8x16xf32>, vector<2x16x16xf32>, vector<2x8x16xf32> -> vector<2x8x16xf32>
    "tpu.trace_stop"() : () -> ()
    %cst_28 = arith.constant 2.500000e-01 : f32
    %42 = vector.broadcast %cst_28 : f32 to vector<2x8x16xf32>
    %43 = arith.mulf %41, %42 : vector<2x8x16xf32>
    %cst_29 = arith.constant dense<0xFF800000> : vector<2x16xf32>
    %44 = vector.multi_reduction <maximumf>, %43, %cst_29 [1] : vector<2x8x16xf32> to vector<2x16xf32>
    %45 = vector.shape_cast %44 : vector<2x16xf32> to vector<2x1x16xf32>
    %46 = vector.broadcast %45 : vector<2x1x16xf32> to vector<2x8x16xf32>
    %47 = arith.subf %43, %46 : vector<2x8x16xf32>
    %48 = math.exp %47 : vector<2x8x16xf32>
    %cst_30 = arith.constant dense<0.000000e+00> : vector<2x16xf32>
    %49 = vector.multi_reduction <add>, %48, %cst_30 [1] : vector<2x8x16xf32> to vector<2x16xf32>
    %50 = vector.shape_cast %49 : vector<2x16xf32> to vector<2x1x16xf32>
    %51 = vector.broadcast %50 : vector<2x1x16xf32> to vector<2x8x16xf32>
    %52 = arith.divf %48, %51 : vector<2x8x16xf32>
    "tpu.trace_start"() <{level = 10 : i32, message = "bqk,bkd->bqd"}> : () -> ()
    %cst_31 = arith.constant dense<0.000000e+00> : vector<2x8x32xf32>
    %53 = tpu.matmul %52, %40, %cst_31 {dimension_numbers = #tpu.dot_dimension_numbers<[2], [1], [1], [2], [0, 0, 0, 1, 1, 2], [0], [0]>, precision = #tpu.contract_precision<fp32>} : vector<2x8x16xf32>, vector<2x16x32xf32>, vector<2x8x32xf32> -> vector<2x8x32xf32>
    "tpu.trace_stop"() : () -> ()
    %54 = vector.shape_cast %53 : vector<2x8x32xf32> to vector<16x32xf32>
    %55 = vector.extract_strided_slice %15 {offsets = [32, 0], sizes = [32, 64], strides = [1, 1]} : vector<64x64xf32> to vector<32x64xf32>
    %cst_32 = arith.constant dense<0.000000e+00> : vector<16x64xf32>
    %56 = tpu.matmul %54, %55, %cst_32 {dimension_numbers = #tpu.dot_dimension_numbers<[1], [0], [0], [1], [0, 0, 1, 1], [], []>, precision = #tpu.contract_precision<fp32>} : vector<16x32xf32>, vector<32x64xf32>, vector<16x64xf32> -> vector<16x64xf32>
    %57 = arith.addf %37, %56 : vector<16x64xf32>
    %58 = vector.broadcast %16 : vector<1x64xf32> to vector<16x64xf32>
    %59 = arith.addf %57, %58 : vector<16x64xf32>
    %60 = vector.shape_cast %59 : vector<16x64xf32> to vector<2x8x64xf32>
    %c0_33 = arith.constant 0 : index
    %c0_34 = arith.constant 0 : index
    %c0_35 = arith.constant 0 : index
    %61 = vector.load %arg9[%c0_33, %c0_34, %c0_35] : memref<2x8x64xf32, #tpu.memory_space<vmem>>, vector<2x8x64xf32>
    tpu.vector_store %arg9[%c0_33, %c0_34, %c0_35], %60 {strides = array<i32>} : memref<2x8x64xf32, #tpu.memory_space<vmem>>, vector<2x8x64xf32>,
    return
  }
  func.func @transform_0(%arg0: i32) -> (i32, i32, i32) {
    %c0_i32 = arith.constant 0 : i32
    %c0_i32_0 = arith.constant 0 : i32
    %c0_i32_1 = arith.constant 0 : i32
    return %arg0, %c0_i32, %c0_i32_0 : i32, i32, i32
  }
  func.func @transform_1(%arg0: i32) -> (i32, i32, i32) {
    %c0_i32 = arith.constant 0 : i32
    %c0_i32_0 = arith.constant 0 : i32
    %c0_i32_1 = arith.constant 0 : i32
    return %arg0, %c0_i32, %c0_i32_0 : i32, i32, i32
  }
  func.func @transform_2(%arg0: i32) -> (i32, i32, i32) {
    %c0_i32 = arith.constant 0 : i32
    %c0_i32_0 = arith.constant 0 : i32
    %c0_i32_1 = arith.constant 0 : i32
    return %arg0, %c0_i32, %c0_i32_0 : i32, i32, i32
  }
  func.func @transform_3(%arg0: i32) -> (i32, i32) {
    %c0_i32 = arith.constant 0 : i32
    %c0_i32_0 = arith.constant 0 : i32
    %c0_i32_1 = arith.constant 0 : i32
    return %c0_i32, %c0_i32_0 : i32, i32
  }
  func.func @transform_4(%arg0: i32) -> (i32, i32) {
    %c0_i32 = arith.constant 0 : i32
    %c0_i32_0 = arith.constant 0 : i32
    %c0_i32_1 = arith.constant 0 : i32
    return %c0_i32, %c0_i32_0 : i32, i32
  }
  func.func @transform_5(%arg0: i32) -> (i32, i32) {
    %c0_i32 = arith.constant 0 : i32
    %c0_i32_0 = arith.constant 0 : i32
    %c0_i32_1 = arith.constant 0 : i32
    return %c0_i32, %c0_i32_0 : i32, i32
  }
  func.func @transform_6(%arg0: i32) -> (i32, i32) {
    %c0_i32 = arith.constant 0 : i32
    %c0_i32_0 = arith.constant 0 : i32
    %c0_i32_1 = arith.constant 0 : i32
    return %c0_i32, %c0_i32_0 : i32, i32
  }
  func.func @transform_7(%arg0: i32) -> (i32, i32) {
    %c0_i32 = arith.constant 0 : i32
    %c0_i32_0 = arith.constant 0 : i32
    %c0_i32_1 = arith.constant 0 : i32
    return %c0_i32, %c0_i32_0 : i32, i32
  }
  func.func @transform_8(%arg0: i32) -> (i32, i32, i32) {
    %c0_i32 = arith.constant 0 : i32
    %c0_i32_0 = arith.constant 0 : i32
    %c0_i32_1 = arith.constant 0 : i32
    return %arg0, %c0_i32, %c0_i32_0 : i32, i32, i32
  }
}

</mosaic_0001>

<bundles_post_ra>
// kernel: tpu_custom_call.1
= control target key start
LH: loop header
LB: loop body
LE: loop exit
PB: predicated region body
PF: predicated region fallthrough
CT: control target
= control target key end

     0   :  { %s10793_s0 = inlined_call_operand.hbm [shape: f32[4,8,32], index: 0, kind: input, shape index: {}]   ;;  %s10794_s1 = inlined_call_operand.hbm [shape: f32[4,16,32], index: 1, kind: input, shape index: {}]   ;;  %s10795_s2 = inlined_call_operand.hbm [shape: f32[4,16,64], index: 2, kind: input, shape index: {}]   ;;  %s10796_s3 = inlined_call_operand.hbm [shape: f32[32,32], index: 3, kind: input, shape index: {}]   ;;  %s10797_s4 = inlined_call_operand.hbm [shape: f32[32,32], index: 4, kind: input, shape index: {}]   ;;  %s10798_s5 = inlined_call_operand.hbm [shape: f32[64,64], index: 5, kind: input, shape index: {}]   ;;  %s10799_s6 = inlined_call_operand.hbm [shape: f32[64,64], index: 6, kind: input, shape index: {}]   ;;  %s10800_s7 = inlined_call_operand.vmem [shape: f32[1,64], index: 7, kind: input, shape index: {}]   ;;  %s10801_s8 = inlined_call_operand.hbm [shape: f32[4,8,64], index: 8, kind: output, shape index: {}]  }
   0x1   :  { %10827 = sst [smem:[#allocation26_spill]] %s10794_s1 }
   0x2   :  { %10828 = sst [smem:[#allocation27_spill]] %s10796_s3 }
   0x3   :  { %10829 = sst [smem:[#allocation28_spill]] %s10798_s5 }
   0x4   :  { %10830 = sst [smem:[#allocation29_spill]] %s10800_s7 }
   0x5   :  { %10831 = sst [smem:[#allocation30_spill]] %s10801_s8 }
   0x6   :  { %13 = vsyncpa [#allocation3], 0 }
   0x7   :  { %15 = vsyncpa [#allocation3 + $0x1], 0 }
   0x8   :  { %16 = vsyncpa [#allocation6], 0 }
   0x9   :  { %18 = vsyncpa [#allocation6 + $0x1], 0 }
   0xa   :  { %19 = vsyncpa [#allocation9], 0 }
   0xb   :  { %20 = vsyncpa [#allocation12], 0 }
   0xc   :  { %21 = vsyncpa [#allocation4], 0 }
   0xd   :  { %23 = vsyncpa [#allocation4 + $0x1], 0  ;;  %s9619_s27 = smov 0   ;;  %s9621_s28 = smov 0  }
   0xe   :  { %s9623_s29 = smov 0   ;;  %s9625_s30 = smov 0  }
   0xf LB: > { %10832 = sst [smem:[#allocation20_spill]] %s9543_s27  ;;  %s9640_s9 = sadd.s32 4294967295, %s9555_s30   ;;  %s9555_s30 = sphi %s9625_s30, %s10871_s30   ;;  %s9551_s29 = sphi %s9623_s29, %s10873_s29   ;;  %s9547_s28 = sphi %s9621_s28, %s10875_s28   ;;  %s9543_s27 = sphi %s9619_s27, %s10874_s27  }
  0x10   : > { %10833 = sst [smem:[#allocation21_spill]] %s9551_s29  ;;  %s7409_s10 = sadd.s32 4294967294, %s9555_s30  }
  0x11   : > { %p49_p0 = scmp.ne.s32.totalorder %s9547_s28, %s9543_s27  ;;  %p10802_p1 = scmp.eq.s32.totalorder %s9640_s9, 0 }
  0x12   : > { %p236_p3 = scmp.eq.s32.totalorder %s7409_s10, 1  ;;  %p7410_p5 = scmp.ge.s32.totalorder %s9555_s30, 1 }
  0x13   : > { %p9649_p4 = por %p10802_p1, %p49_p0  ;;  %p243_p7 = scmp.lt.s32.totalorder %s9555_s30, 3 }
  0x14   : > { %p9654_p6 = por %p236_p3, %p49_p0  ;;  %s9557_s14 = smov [#allocation8]  }
  0x15   : > { %s10834_s11 = scalar_select %p9649_p4, 1, 0 }
  0x16   : > { %s10835_s12 = scalar_select %p9654_p6, 1, 0 }
  0x17   : > { %p9659_p8 = pnand %p7410_p5, %p243_p7  ;;  %s255_s15 = sshll.u32 %s9557_s14, 4  ;;  %s9663_s15 = int_to_ptr.vmem [resolvable:$true] %s255_s15 }
  0x18   : > { %10836 = sst [smem:[#allocation22_spill]] %s10835_s12  ;;  %s9558_s17 = smov [#allocation11]  }
  0x19   : > { %s10837_s13 = scalar_select %p9659_p8, 1, 0 }
  0x1a   : > { %p9177_p9 = pneg %p9659_p8  ;;  %s281_s18 = sshll.u32 %s9558_s17, 4  ;;  %s9674_s18 = int_to_ptr.vmem [resolvable:$true] %s281_s18 }
  0x1b   : > { %s10839_s3 = sld [smem:[#allocation27_spill]] }
  0x1c   : > { %p9670_p11 = pnand %p9177_p9, %p10802_p1 }
  0x1e   : > { %s10838_s16 = scalar_select %p9670_p11, 1, 0 }
  0x1f   : > { %p9684_p13 = pneg %p9670_p11 }
  0x21   : > { %s9275_s21 = scalar_lea.hbm %s10839_s3, 512 }
  0x22   : > { %p9276_p12 = scmp.ne.s32.totalorder %s10839_s3, %s9275_s21  ;;  %p9282_p5 = scmp.lt.u32.totalorder %s9275_s21, %s10839_s3 }
  0x23   : > { %s10840_s24 = scalar_select %p9684_p13, 1, 0 }
  0x24   : > { %p9278_p0 = pnand %p9684_p13, %p9276_p12 }
  0x26   : > { %p9279_p3 = pneg %p9278_p0 }
  0x28   : > { %p9284_p7 = pnand %p9282_p5, %p9279_p3 }
  0x2a   : > { %9287 = shalt.err (!%p9284_p7)
}
  0x2b   : > { %s9288_s10 = scalar_lea.vmem %s9663_s15, 512  ;;  %p9296_p2 = scmp.lt.s32.totalorder %s9663_s15, %s9663_s15 }
  0x2c   : > { %p9289_p9 = scmp.ne.s32.totalorder %s9663_s15, %s9288_s10  ;;  %p9297_p6 = scmp.lt.s32.totalorder %s9288_s10, %s9288_s10 }
  0x2e   : > { %p9291_p10 = pnand %p9289_p9, %p9684_p13  ;;  %p9298_p12 = por %p9297_p6, %p9296_p2 }
  0x30   : > { %p9292_p1 = pneg %p9291_p10 }
  0x32   : > { %p9299_p0 = pnand %p9298_p12, %p9292_p1 }
  0x34   : > { %9302 = shalt.err (!%p9299_p0)
}
  0x35   : > { %s10804_s14 = smov 128   ;;  %s10806_s17 = smov 8  }
  0x36   : > { %9180 = dma.hbm_to_vmem [thread:$0]  (!%p9670_p11), %s10839_s3, 512, %s9663_s15, [#allocation9], %s10804_s14, %s10804_s14, %s10806_s17  }
  0x37   : > { %s10841_s5 = sld [smem:[#allocation28_spill]] }
  0x3d   : > { %s9303_s23 = scalar_lea.hbm %s10841_s5, 1024 }
  0x3e   : > { %p9304_p1 = scmp.ne.s32.totalorder %s10841_s5, %s9303_s23  ;;  %p9310_p10 = scmp.lt.u32.totalorder %s9303_s23, %s10841_s5 }
  0x40   : > { %p9306_p2 = pnand %p9304_p1, %p9684_p13 }
  0x42   : > { %p9307_p6 = pneg %p9306_p2 }
  0x44   : > { %p9312_p3 = pnand %p9310_p10, %p9307_p6 }
  0x46   : > { %9315 = shalt.err (!%p9312_p3)
}
  0x47   : > { %s9316_s15 = scalar_lea.vmem %s9674_s18, 1024  ;;  %p9324_p12 = scmp.lt.s32.totalorder %s9674_s18, %s9674_s18 }
  0x48   : > { %p9317_p5 = scmp.ne.s32.totalorder %s9674_s18, %s9316_s15  ;;  %p9325_p0 = scmp.lt.s32.totalorder %s9316_s15, %s9316_s15 }
  0x4a   : > { %p9319_p7 = pnand %p9317_p5, %p9684_p13  ;;  %p9326_p1 = por %p9325_p0, %p9324_p12 }
  0x4c   : > { %p9320_p9 = pneg %p9319_p7 }
  0x4e   : > { %p9327_p2 = pnand %p9326_p1, %p9320_p9 }
  0x50   : > { %9330 = shalt.err (!%p9327_p2)
}
  0x51   : > { %9186 = dma.hbm_to_vmem [thread:$0]  (!%p9670_p11), %s10841_s5, 1024, %s9674_s18, [#allocation12], %s10804_s14, %s10804_s14, %s10806_s17  }
  0x52   : > { %s9735_s20 = sadd.s32 1, %s9555_s30   ;;  %s36_s21 = sadd.s32 1, %s9551_s29 }
  0x53   : > { %10842 = sst [smem:[#allocation23_spill]] %s9735_s20  ;;  %s33_s22 = ssub.s32 %s9555_s30, %s9735_s20 }
  0x54   : > { %p43_p6 = scmp.ne.s32.totalorder %s9551_s29, %s9547_s28  ;;  %p34_p10 = scmp.eq.s32.totalorder %s33_s22, 0 }
  0x55   : > { %p44_p3 = scmp.eq.s32.totalorder %s9555_s30, 0  ;;  %p10843_p5 = scmp.eq.s32.totalorder %s9640_s9, 1 }
  0x56   : > { %p9208_p9 = scmp.lt.s32.totalorder %s9555_s30, 2  ;;  %s9754_s26 = sand.u32 1, %s9551_s29  }
  0x57   : > { %p9745_p7 = por %p10843_p5, %p43_p6  ;;  %p45_p12 = por %p44_p3, %p43_p6 }
  0x58   : > { %s9751_s25 = scalar_select %p34_p10, %s9551_s29, %s36_s21  }
  0x59   : > { %s10844_s23 = scalar_select %p9745_p7, 1, 0 }
  0x5a   : > { %10846 = sst [smem:[#allocation25_spill]] %s9751_s25  ;;  %s332_s18 = sand.u32 1, %s9555_s30  }
  0x5b   : > { %10845 = sst [smem:[#allocation24_spill]] %s10844_s23  ;;  %s10811_s10 = sshll.u32 %s9754_s26, 5 }
  0x5c   : > { %p9758_p0 = pnand %p9208_p9, %p45_p12  ;;  %s7444_s12 = sshll.u32 %s9555_s30, 9 }
  0x5d   : > { %s10848_s1 = sld [smem:[#allocation26_spill]]  ;;  %s336_s21 = scalar_lea.vmem [#allocation5], %s10811_s10 }
  0x5e   : > { %s10847_s15 = scalar_select %p9758_p0, 1, 0 }
  0x5f   : > { %s344_s17 = sshll.u32 %s336_s21, 4  ;;  %s9775_s25 = scalar_lea.hbm %s10795_s2, %s7444_s12  ;;  %s9770_s17 = int_to_ptr.vmem [resolvable:$true] %s344_s17 }
  0x60   : > { %s9777_s29 = scalar_lea.sflag [#allocation6], %s332_s18  ;;  %p9783_p2 = pneg %p9758_p0 }
  0x62   : > { %s10849_s19 = scalar_select %p9783_p2, 1, 0 }
  0x63   : > { %s9766_s14 = scalar_lea.hbm %s10848_s1, %s7444_s12  ;;  %s9336_s10 = scalar_lea.hbm %s10848_s1, 1024 }
  0x64   : > { %s9331_s20 = scalar_lea.hbm %s9766_s14, 512  ;;  %p9337_p3 = scmp.lt.u32.totalorder %s9766_s14, %s10848_s1 }
  0x65   : > { %p9332_p1 = scmp.ne.s32.totalorder %s9766_s14, %s9331_s20  ;;  %p9338_p5 = scmp.lt.u32.totalorder %s9336_s10, %s9331_s20 }
  0x66   : > { %p9340_p12 = scmp.lt.u32.totalorder %s9331_s20, %s9766_s14 }
  0x67   : > { %p9334_p6 = pnand %p9783_p2, %p9332_p1  ;;  %p9339_p9 = por %p9338_p5, %p9337_p3 }
  0x69   : > { %p9335_p10 = pneg %p9334_p6  ;;  %p9341_p7 = por %p9340_p12, %p9339_p9 }
  0x6b   : > { %p9342_p4 = pnand %p9341_p7, %p9335_p10 }
  0x6d   : > { %9345 = shalt.err (!%p9342_p4)
}
  0x6e   : > { %s9346_s18 = scalar_lea.vmem %s9770_s17, 512  ;;  %s9561_s12 = smov [#allocation5]  }
  0x6f   : > { %p9347_p1 = scmp.ne.s32.totalorder %s9770_s17, %s9346_s18  ;;  %s9351_s22 = sshll.u32 %s9561_s12, 4  ;;  %s9352_s22 = int_to_ptr.vmem [resolvable:$false] %s9351_s22 }
  0x70   : > { %s9353_s21 = scalar_lea.vmem %s9352_s22, 1024  ;;  %p9354_p11 = scmp.lt.s32.totalorder %s9770_s17, %s9352_s22 }
  0x71   : > { %p9349_p6 = pnand %p9347_p1, %p9783_p2  ;;  %p9355_p13 = scmp.lt.s32.totalorder %s9353_s21, %s9346_s18 }
  0x73   : > { %p9350_p8 = pneg %p9349_p6  ;;  %p9356_p3 = por %p9355_p13, %p9354_p11 }
  0x75   : > { %p9357_p5 = pnand %p9356_p3, %p9350_p8 }
  0x77   : > { %9360 = shalt.err (!%p9357_p5)
}
  0x78   : > { %s10850_s20 = smov 8   ;;  %s10851_s10 = smov 128  }
  0x79   : > { %9196 = dma.hbm_to_vmem [thread:$0]  (!%p9758_p0), %s9766_s14, 512, %s9770_s17, %s9777_s29, %s10851_s10, %s10851_s10, %s10850_s20  }
  0x7a   : > { %s10852_s3 = sshll.u32 %s9754_s26, 5  ;;  %s9562_s18 = smov [#allocation10]  }
  0x7b   : > { %s358_s5 = scalar_lea.vmem [#allocation7], %s10852_s3  ;;  %s268_s22 = sshll.u32 %s9562_s18, 4  ;;  %s269_s22 = int_to_ptr.vmem [resolvable:$true] %s268_s22 }
  0x7c   : > { %s366_s12 = sshll.u32 %s358_s5, 4  ;;  %s9361_s27 = scalar_lea.hbm %s10797_s4, 512  ;;  %s9812_s12 = int_to_ptr.vmem [resolvable:$true] %s366_s12 }
  0x7d   : > { %p9362_p4 = scmp.ne.s32.totalorder %s10797_s4, %s9361_s27  ;;  %p10853_p8 = scmp.ne.s32.totalorder %s10840_s24, 0 }
  0x7e   : > { %p9368_p7 = scmp.lt.u32.totalorder %s9361_s27, %s10797_s4 }
  0x7f   : > { %p9364_p11 = pnand %p9362_p4, %p10853_p8 }
  0x81   : > { %p9365_p13 = pneg %p9364_p11 }
  0x83   : > { %p9370_p10 = pnand %p9368_p7, %p9365_p13 }
  0x85   : > { %9373 = shalt.err (!%p9370_p10)
}
  0x86   : > { %s9374_s3 = scalar_lea.vmem %s269_s22, 512  ;;  %p9382_p6 = scmp.lt.s32.totalorder %s269_s22, %s269_s22 }
  0x87   : > { %p9375_p9 = scmp.ne.s32.totalorder %s269_s22, %s9374_s3  ;;  %p9383_p3 = scmp.lt.s32.totalorder %s9374_s3, %s9374_s3 }
  0x89   : > { %p9377_p12 = pnand %p9375_p9, %p10853_p8  ;;  %p9384_p5 = por %p9383_p3, %p9382_p6 }
  0x8b   : > { %p9378_p1 = pneg %p9377_p12 }
  0x8d   : > { %p9385_p0 = pnand %p9384_p5, %p9378_p1 }
  0x8f   : > { %9388 = shalt.err (!%p9385_p0)
}
  0x90   : > { %p10854_p4 = scmp.ne.s32.totalorder %s10838_s16, 0  ;;  %s9563_s8 = smov [#allocation13]  }
  0x91   : > { %s294_s27 = sshll.u32 %s9563_s8, 4  ;;  %s7416_s5 = sshll.u32 %s9754_s26, 4  ;;  %s295_s27 = int_to_ptr.vmem [resolvable:$true] %s294_s27 }
  0x92   : > { %9183 = dma.hbm_to_vmem [thread:$0]  (!%p10854_p4), %s10797_s4, 512, %s269_s22, [#allocation9], %s10851_s10, %s10851_s10, %s10850_s20  }
  0x93   : > { %s9389_s14 = scalar_lea.hbm %s10799_s6, 1024 }
  0x94   : > { %p9390_p0 = scmp.ne.s32.totalorder %s10799_s6, %s9389_s14  ;;  %p9396_p7 = scmp.lt.u32.totalorder %s9389_s14, %s10799_s6 }
  0x96   : > { %p9392_p11 = pnand %p9390_p0, %p10853_p8 }
  0x98   : > { %p9393_p13 = pneg %p9392_p11 }
  0x9a   : > { %p9398_p10 = pnand %p9396_p7, %p9393_p13 }
  0x9c   : > { %9401 = shalt.err (!%p9398_p10)
}
  0x9d   : > { %s9402_s22 = scalar_lea.vmem %s295_s27, 1024  ;;  %p9410_p6 = scmp.lt.s32.totalorder %s295_s27, %s295_s27 }
  0x9e   : > { %p9403_p9 = scmp.ne.s32.totalorder %s295_s27, %s9402_s22  ;;  %p9411_p3 = scmp.lt.s32.totalorder %s9402_s22, %s9402_s22 }
  0xa0   : > { %p9405_p12 = pnand %p9403_p9, %p10853_p8  ;;  %p9412_p5 = por %p9411_p3, %p9410_p6 }
  0xa2   : > { %p9406_p1 = pneg %p9405_p12 }
  0xa4   : > { %p9413_p2 = pnand %p9412_p5, %p9406_p1 }
  0xa6   : > { %9416 = shalt.err (!%p9413_p2)
}
  0xa7   : > { %9189 = dma.hbm_to_vmem [thread:$0]  (!%p10854_p4), %s10799_s6, 1024, %s295_s27, [#allocation12], %s10851_s10, %s10851_s10, %s10850_s20  }
  0xa8   : > { %s7442_s24 = sshll.u32 %s9555_s30, 8  ;;  %s315_s16 = scalar_lea.vmem [#allocation2], %s7416_s5 }
  0xa9   : > { %s9861_s21 = scalar_lea.hbm %s10793_s0, %s7442_s24  ;;  %s322_s14 = sshll.u32 %s315_s16, 4  ;;  %s9863_s14 = int_to_ptr.vmem [resolvable:$true] %s322_s14 }
  0xaa   : > { %s312_s17 = scalar_lea.sflag [#allocation3], %s9754_s26  ;;  %s9417_s3 = scalar_lea.hbm %s9861_s21, 256 }
  0xab   : > { %p9418_p2 = scmp.ne.s32.totalorder %s9861_s21, %s9417_s3  ;;  %p10855_p8 = scmp.ne.s32.totalorder %s10849_s19, 0 }
  0xac   : > { %s9422_s22 = scalar_lea.hbm %s10793_s0, 512  ;;  %p9423_p11 = scmp.lt.u32.totalorder %s9861_s21, %s10793_s0 }
  0xad   : > { %p9420_p0 = pnand %p9418_p2, %p10855_p8  ;;  %p9424_p13 = scmp.lt.u32.totalorder %s9422_s22, %s9417_s3 }
  0xae   : > { %p9426_p10 = scmp.lt.u32.totalorder %s9417_s3, %s9861_s21 }
  0xaf   : > { %p9421_p4 = pneg %p9420_p0  ;;  %p9425_p7 = por %p9424_p13, %p9423_p11 }
  0xb1   : > { %p9427_p9 = por %p9426_p10, %p9425_p7 }
  0xb3   : > { %p9428_p12 = pnand %p9427_p9, %p9421_p4 }
  0xb5   : > { %9431 = shalt.err (!%p9428_p12)
}
  0xb6   : > { %s9432_s5 = scalar_lea.vmem %s9863_s14, 256  ;;  %s9564_s24 = smov [#allocation2]  }
  0xb7   : > { %p9433_p1 = scmp.ne.s32.totalorder %s9863_s14, %s9432_s5  ;;  %s9437_s8 = sshll.u32 %s9564_s24, 4  ;;  %s9438_s8 = int_to_ptr.vmem [resolvable:$false] %s9437_s8 }
  0xb8   : > { %s9439_s18 = scalar_lea.vmem %s9438_s8, 512  ;;  %p9440_p5 = scmp.lt.s32.totalorder %s9863_s14, %s9438_s8 }
  0xb9   : > { %p9435_p6 = pnand %p9433_p1, %p10855_p8  ;;  %p9441_p2 = scmp.lt.s32.totalorder %s9439_s18, %s9432_s5 }
  0xbb   : > { %p9436_p3 = pneg %p9435_p6  ;;  %p9442_p0 = por %p9441_p2, %p9440_p5 }
  0xbd   : > { %p9443_p11 = pnand %p9442_p0, %p9436_p3 }
  0xbf   : > { %9446 = shalt.err (!%p9443_p11)
}
  0xc0   : > { %p10856_p4 = scmp.ne.s32.totalorder %s10847_s15, 0  ;;  %s9447_s16 = scalar_lea.hbm %s9775_s25, 512 }
  0xc1   : > { %p9448_p13 = scmp.ne.s32.totalorder %s9775_s25, %s9447_s16  ;;  %s9452_s1 = scalar_lea.hbm %s10795_s2, 1024 }
  0xc2   : > { %9193 = dma.hbm_to_vmem [thread:$0]  (!%p10856_p4), %s9861_s21, 256, %s9863_s14, %s312_s17, %s10851_s10, %s10851_s10, %s10850_s20  }
  0xc3   : > { %p9450_p7 = pnand %p9448_p13, %p10855_p8  ;;  %p9453_p9 = scmp.lt.u32.totalorder %s9775_s25, %s10795_s2 }
  0xc4   : > { %p9454_p12 = scmp.lt.u32.totalorder %s9452_s1, %s9447_s16  ;;  %p9456_p6 = scmp.lt.u32.totalorder %s9447_s16, %s9775_s25 }
  0xc5   : > { %p9451_p10 = pneg %p9450_p7 }
  0xc6   : > { %p9455_p1 = por %p9454_p12, %p9453_p9 }
  0xc8   : > { %p9457_p3 = por %p9456_p6, %p9455_p1 }
  0xca   : > { %p9458_p5 = pnand %p9457_p3, %p9451_p10 }
  0xcc   : > { %9461 = shalt.err (!%p9458_p5)
}
  0xcd   : > { %s9462_s26 = scalar_lea.vmem %s9812_s12, 512  ;;  %s9565_s21 = smov [#allocation7]  }
  0xce   : > { %p9463_p2 = scmp.ne.s32.totalorder %s9812_s12, %s9462_s26  ;;  %s9467_s14 = sshll.u32 %s9565_s21, 4  ;;  %s9468_s14 = int_to_ptr.vmem [resolvable:$false] %s9467_s14 }
  0xcf   : > { %s9469_s17 = scalar_lea.vmem %s9468_s14, 1024  ;;  %p9470_p13 = scmp.lt.s32.totalorder %s9812_s12, %s9468_s14 }
  0xd0   : > { %p9465_p0 = pnand %p9463_p2, %p10855_p8  ;;  %p9471_p7 = scmp.lt.s32.totalorder %s9469_s17, %s9462_s26 }
  0xd2   : > { %p9466_p11 = pneg %p9465_p0  ;;  %p9472_p9 = por %p9471_p7, %p9470_p13 }
  0xd4   : > { %p9473_p12 = pnand %p9472_p9, %p9466_p11 }
  0xd6   : > { %9476 = shalt.err (!%p9473_p12)
}
  0xd7   : > { %9199 = dma.hbm_to_vmem [thread:$0]  (!%p10856_p4), %s9775_s25, 512, %s9812_s12, %s9777_s29, %s10851_s10, %s10851_s10, %s10850_s20  }
  0xd8   : > { %p10857_p8 = scmp.ne.s32.totalorder %s10837_s13, 0 }
  0xd9   : > { %s9920_s19 = sand.u32 (!%p10857_p8), 1, %s9547_s28   ;;  %p10858_p10 = scmp.ne.s32.totalorder (!%p10857_p8), %s10834_s11, 0 }
  0xda   : > { %378 = sbr.rel (%p10857_p8) target bundleno = 1874 (0x752), region = 52  ;;  %s7428_s7 = sshll.u32 (!%p10857_p8), %s9920_s19, 4 }
  0xdb   : > { %s381_s5 = scalar_lea.sflag (!%p10857_p8), [#allocation3], %s9920_s19  ;;  %s384_s15 = scalar_lea.vmem (!%p10857_p8), [#allocation2], %s7428_s7 }
  0xe1   : > { %9522 = dma.done.wait (%p10858_p10), %s381_s5, 256  }
  0xe2   : > { %9524 = vsyncadd (%p10858_p10), %s381_s5, 4294967040  ;;  %s389_s29 = sand.u32 1, %s9640_s9   ;;  %s7429_s13 = sshll.u32 %s9920_s19, 5 }
  0xe3   : > { %s390_s25 = scalar_lea.sflag [#allocation6], %s389_s29  ;;  %s9932_s20 = scalar_lea.vmem [#allocation5], %s7429_s13 }
  0xe4   : > { %9526 = dma.done.wait (%p10858_p10), %s390_s25, 1024  }
  0xe5   : > { %9528 = vsyncadd (%p10858_p10), %s390_s25, 4294966272  ;;  %s9938_s10 = scalar_lea.vmem [#allocation7], %s7429_s13  ;;  %p10859_p4 = scmp.eq.s32.totalorder %s9640_s9, 0 }
  0xe7   : > { %9530 = dma.done.wait (%p10859_p4), [#allocation9], 1024   ;;  %p10860_p1 = pmov %p10859_p4 }
  0xe9   : > { %9532 = vsyncadd (%p10860_p1), [#allocation9], 4294966272  ;;  %p10861_p6 = pmov %p10860_p1 }
  0xea   : > { %p10862_p3 = pmov %p10860_p1 }
  0xeb   : > { %9534 = dma.done.wait (%p10861_p6), [#allocation12], 2048  }
  0xec   : > { %9536 = vsyncadd (%p10862_p3), [#allocation12], 4294965248  ;;  %vm479_vm0 = vcmask 261120   ;;  %v475_v0 = vld [vmem:[#allocation8] sm:$0xff]  ;;  %v476_v1 = vld [vmem:[#allocation8 + $0x8] sm:$0xff]  ;;  %vm1652_vm1 = vcmask 523264  }
  0xed   : > { %v477_v2 = vld [vmem:[#allocation8 + $0x10] sm:$0xff]  ;;  %v487_v3 = vand.u32 4294901760, %v475_v0  ;;  %v490_v4 = vand.u32 4294901760, %v476_v1  ;;  %v478_v5 = vld [vmem:[#allocation8 + $0x18] sm:$0xff]  ;;  %v9978_v26 = vld [vmem:[#allocation10] sm:$0xff]  ;;  %vm9567_vm2 = vmmov 0  }
  0xee   : > { %v493_v6 = vand.u32 4294901760, %v477_v2  ;;  %v465_v7 = vld [vmem:[%s384_s15] sm:$0xff]  ;;  %v466_v8 = vld [vmem:[%s384_s15 + $0x8] sm:$0xff]  ;;  %v496_v9 = vand.u32 4294901760, %v478_v5  ;;  %v1031_v38 = vand.u32 4294901760, %v9978_v26  ;;  %s9569_s11 = smov 112  }
  0xef   : > { %v481_v10 = vsel %vm479_vm0, %v465_v7, 0  ;;  %v484_v11 = vsel %vm479_vm0, %v466_v8, 0  ;;  %v9950_v12 = vpack.c.bf16 %v490_v4, %v487_v3  ;;  %v9956_v15 = vsub.f32 %v475_v0, %v487_v3  ;;  %v9986_v30 = vld [vmem:[#allocation10 + $0x8] sm:$0xff]  ;;  %v9997_v34 = vld [vmem:[#allocation10 + $0x10] sm:$0xff]  ;;  %v10006_v39 = vld [vmem:[#allocation10 + $0x18] sm:$0xff]  ;;  %s9570_s12 = smov 96  }
  0xf0   : > { %v9952_v13 = vand.u32 4294901760, %v481_v10  ;;  %v9954_v14 = vand.u32 4294901760, %v484_v11  ;;  %v9958_v16 = vpack.c.bf16 %v496_v9, %v493_v6  ;;  %v9960_v17 = vsub.f32 %v476_v1, %v490_v4  ;;  %v467_v40 = vld [vmem:[%s9932_s20] sm:$0xff]  ;;  %v468_v56 = vld [vmem:[%s9932_s20 + $0x8] sm:$0xff]  ;;  %v469_v57 = vld [vmem:[%s9932_s20 + $0x10] sm:$0xff]  ;;  %s10863_s24 = sld [smem:[#allocation24_spill]] }
  0xf1   : > { %v9962_v18 = vsub.f32 %v477_v2, %v493_v6  ;;  %v9964_v19 = vsub.f32 %v478_v5, %v496_v9  ;;  %8571 = vmatprep.subr.bf16.mxu0 %v9950_v12  ;;  %v578_v22 = vand.u32 4294901760, %v9956_v15  ;;  %v1034_v44 = vand.u32 4294901760, %v9986_v30  ;;  %v470_v61 = vld [vmem:[%s9932_s20 + $0x18] sm:$0xff]  ;;  %s460_s8 = scalar_lea.vmem [#allocation14], %s7428_s7  ;;  %s10864_s27 = sld [smem:[#allocation29_spill]] }
  0xf2   : > { %v9968_v20 = vsub.f32 %v481_v10, %v9952_v13  ;;  %v9971_v21 = vsub.f32 %v484_v11, %v9954_v14  ;;  %8573 = vmatpush3.bf16.msra.mxu0 %v9950_v12  ;;  %v585_v23 = vand.u32 4294901760, %v9960_v17  ;;  %v1037_v47 = vand.u32 4294901760, %v9997_v34  ;;  %s7255_s18 = sshll.u32 %s460_s8, 4  ;;  %s7447_s1 = sshll.u32 %s9640_s9, 8  ;;  %s10742_s18 = int_to_ptr.vmem [resolvable:$true] %s7255_s18 }
  0xf3   : > { %v592_v24 = vand.u32 4294901760, %v9962_v18  ;;  %v599_v25 = vand.u32 4294901760, %v9964_v19  ;;  %8575 = vmatprep.subr.bf16.mxu0 %v9958_v16  ;;  %v579_v29 = vsub.f32 %v9956_v15, %v578_v22  ;;  %v1040_v50 = vand.u32 4294901760, %v10006_v39  ;;  %s10865_s26 = sld [smem:[#allocation30_spill]]  ;;  %s7242_s14 = scalar_lea.sflag [#allocation4], %s9920_s19 }
  0xf4   : > { %v557_v27 = vand.u32 4294901760, %v9968_v20  ;;  %v567_v28 = vand.u32 4294901760, %v9971_v21  ;;  %v586_v31 = vsub.f32 %v9960_v17, %v585_v23  ;;  %v1019_v51 = vsel %vm479_vm0, %v467_v40, 0  ;;  %v471_v40 = vld [vmem:[%s9938_s10] sm:$0xff]  ;;  %s9477_s9 = scalar_lea.vmem %s10742_s18, 256  ;;  %s9571_s17 = smov [#allocation14]  }
  0xf5   : > { %v593_v32 = vsub.f32 %v9962_v18, %v592_v24  ;;  %v600_v33 = vsub.f32 %v9964_v19, %v599_v25  ;;  %v580_v37 = vand.u32 4294901760, %v579_v29  ;;  %v10016_v52 = vpack.c.bf16 %v1034_v44, %v1031_v38  ;;  %p9478_p5 = scmp.ne.s32.totalorder %s10742_s18, %s9477_s9  ;;  %s9481_s7 = sshll.u32 %s9571_s17, 4  ;;  %s9482_s7 = int_to_ptr.vmem [resolvable:$false] %s9481_s7 }
  0xf6   : > { %v558_v35 = vsub.f32 %v9968_v20, %v557_v27  ;;  %v568_v36 = vsub.f32 %v9971_v21, %v567_v28  ;;  %8577 = vmatpush3.bf16.msra.mxu0 %v9958_v16  ;;  %v587_v41 = vand.u32 4294901760, %v586_v31  ;;  %v10019_v53 = vand.u32 4294901760, %v1019_v51  ;;  %p10866_p2 = scmp.ne.s32.totalorder %s10863_s24, 0  ;;  %s9483_s5 = scalar_lea.vmem %s9482_s7, 512 }
  0xf7   : > { %v594_v42 = vand.u32 4294901760, %v593_v32  ;;  %v601_v43 = vand.u32 4294901760, %v600_v33  ;;  %v8586_v54 = vpack.c.bf16 %v9960_v17, %v9956_v15  ;;  %v10023_v55 = vpack.c.bf16 %v1040_v50, %v1037_v47  ;;  %8659 = vmatprep.subr.bf16.mxu1 %v10016_v52  ;;  %p9484_p13 = scmp.lt.s32.totalorder %s10742_s18, %s9482_s7  ;;  %p9485_p7 = scmp.lt.s32.totalorder %s9483_s5, %s9477_s9 }
  0xf8   : > { %v559_v45 = vand.u32 4294901760, %v558_v35  ;;  %v569_v46 = vand.u32 4294901760, %v568_v36  ;;  %v8578_v48 = vpack.c.bf16 %v587_v41, %v580_v37  ;;  %8661 = vmatpush3.bf16.msra.mxu1 %v10016_v52  ;;  %7964 = vmatprep.mubr.f32.mxu1 %v10019_v53  ;;  %v1022_v58 = vsel %vm479_vm0, %v468_v56, 0  ;;  %v1648_v56 = vld [vmem:[#allocation11 + $0x20] sm:$0xff]  ;;  %p9479_p0 = pnand %p9478_p5, %p10866_p2 }
  0xf9   : > { %v8582_v49 = vpack.c.bf16 %v601_v43, %v594_v42  ;;  %8663 = vmatprep.subr.bf16.mxu1 %v10023_v55  ;;  %v8590_v59 = vpack.c.bf16 %v9964_v19, %v9962_v18  ;;  %v1025_v60 = vsel %vm479_vm0, %v469_v57, 0  ;;  %v10038_v62 = vand.u32 4294901760, %v1022_v58  ;;  %s10747_s21 = scalar_lea.hbm %s10865_s26, %s7447_s1  ;;  %p9486_p9 = por %p9485_p7, %p9484_p13 }
  0xfa   : > { %7828 = vmatprep.mubr.f32.mxu0 %v559_v45  ;;  %8579 = vmatprep.subr.bf16.mxu0 %v8578_v48  ;;  %v10041_v63 = vand.u32 4294901760, %v1025_v60  ;;  %v1028_v0 = vsel %vm479_vm0, %v470_v61, 0  ;;  %v8602_v2 = vpack.c.bf16 %v585_v23, %v578_v22  ;;  %v8606_v3 = vpack.c.bf16 %v599_v25, %v592_v24  ;;  %v1645_v45 = vld [vmem:[#allocation11 + $0x8] sm:$0xff]  ;;  %p9480_p11 = pneg %p9479_p0 }
  0xfb   : > { %7829 = vmatmul.mubr.f32.vlgmr.msra.gmra.mrb[0].mxu0 %v569_v46  ;;  %v10046_v1 = vand.u32 4294901760, %v1028_v0  ;;  %v10068_v4 = vsub.f32 %v1019_v51, %v10019_v53  ;;  %v10073_v5 = vsub.f32 %v9978_v26, %v1031_v38  ;;  %v10076_v6 = vsub.f32 %v9986_v30, %v1034_v44  ;;  %v1644_v44 = vld [vmem:[#allocation11] sm:$0xff]  ;;  %v472_v51 = vld [vmem:[%s9938_s10 + $0x8] sm:$0xff] }
  0xfc   : > { %8581 = vmatpush3.bf16.msra.mxu0 %v8578_v48  ;;  %7839 = vmatprep.mubr.f32.mxu0 %v9952_v13  ;;  %v10083_v10 = vsub.f32 %v9997_v34, %v1037_v47  ;;  %v10086_v11 = vsub.f32 %v10006_v39, %v1040_v50  ;;  %v10090_v15 = vsub.f32 %v1022_v58, %v10038_v62  ;;  %v1654_v41 = vsel %vm1652_vm1, %v471_v40, 0  ;;  %v1646_v50 = vld [vmem:[#allocation11 + $0x10] sm:$0xff]  ;;  %p9487_p12 = pnand %p9486_p9, %p9480_p11 }
  0xfd   : > { %8583 = vmatprep.subr.bf16.mxu0 %v8582_v49  ;;  %8665 = vmatpush3.bf16.msra.mxu1 %v10023_v55  ;;  %v1101_v7 = vand.u32 4294901760, %v10068_v4  ;;  %v1142_v8 = vand.u32 4294901760, %v10073_v5  ;;  %v1149_v9 = vand.u32 4294901760, %v10076_v6  ;;  %v10098_v18 = vsub.f32 %v1025_v60, %v10041_v63 }
  0xfe   : > { %v10111_v22 = vsub.f32 %v1028_v0, %v10046_v1  ;;  %v8634_v38 = vpack.c.bf16 %v10076_v6, %v10073_v5  ;;  %v8638_v39 = vpack.c.bf16 %v10086_v11, %v10083_v10  ;;  %v10149_v42 = vand.u32 4294901760, %v1654_v41 }
  0xff   : > { %v1102_v17 = vsub.f32 %v10068_v4, %v1101_v7  ;;  %v1143_v19 = vsub.f32 %v10073_v5, %v1142_v8  ;;  %v1121_v24 = vand.u32 4294901760, %v10098_v18  ;;  %v8650_v43 = vpack.c.bf16 %v1149_v9, %v1142_v8 }
 0x100   : > { %8585 = vmatpush3.bf16.msra.mxu0 %v8582_v49  ;;  %7965 = vmatmul.mubr.f32.vlgmr.msra.gmra.mrb[0].mxu1 %v10038_v62  ;;  %v10161_v46 = vsub.f32 %v1654_v41, %v10149_v42  ;;  %v1666_v48 = vand.u32 4294901760, %v1644_v44  ;;  %v1669_v49 = vand.u32 4294901760, %v1645_v45  ;;  %v1678_v5 = vand.u32 4294901760, %v1648_v56 }
 0x101   : > { %8587 = vmatprep.subr.bf16.mxu0 %v8586_v54  ;;  %7967 = vmatprep.mubr.f32.mxu1 %v10041_v63  ;;  %v1103_v23 = vand.u32 4294901760, %v1102_v17  ;;  %v1144_v25 = vand.u32 4294901760, %v1143_v19  ;;  %v1122_v30 = vsub.f32 %v10098_v18, %v1121_v24  ;;  %vm2340_vm3 = vcmask 130048  }
 0x102   : > { %v1740_v57 = vand.u32 4294901760, %v10161_v46  ;;  %v10172_v58 = vsub.f32 %v1644_v44, %v1666_v48  ;;  %v10175_v60 = vpack.c.bf16 %v1669_v49, %v1666_v48  ;;  %v10177_v0 = vsub.f32 %v1645_v45, %v1669_v49 }
 0x103   : > { %7840 = vmatmul.mubr.f32.vlgmr.msra.gmra.mrb[0].mxu0 %v9954_v14  ;;  %v1123_v35 = vand.u32 4294901760, %v1122_v30 }
 0x104   : > { %8589 = vmatpush3.bf16.msra.mxu0 %v8586_v54  ;;  %7850 = vmatprep.mubr.f32.mxu0 %v9968_v20  ;;  %v1150_v20 = vsub.f32 %v10076_v6, %v1149_v9  ;;  %v473_v54 = vld [vmem:[%s9938_s10 + $0x10] sm:$0xff] }
 0x105   : > { %8591 = vmatprep.subr.bf16.mxu0 %v8590_v59  ;;  %7968 = vmatmul.mubr.f32.gmra.mrb[2].mxu1 %v10046_v1  ;;  %v1650_v6 = vld [vmem:[#allocation11 + $0x30] sm:$0xff] }
 0x106   : > { %v1151_v26 = vand.u32 4294901760, %v1150_v20  ;;  %v1788_v20 = vand.u32 4294901760, %v10177_v0 }
 0x108   : > { %8593 = vmatpush3.bf16.msra.mxu0 %v8590_v59  ;;  %v8626_v31 = vpack.c.bf16 %v1151_v26, %v1144_v25  ;;  %v1657_v59 = vsel %vm1652_vm1, %v472_v51, 0 }
 0x109   : > { %8595 = vmatprep.subr.bf16.mxu0 %v9950_v12  ;;  %v10183_v8 = vand.u32 4294901760, %v1657_v59 }
 0x10b   : > { %7851 = vmatmul.mubr.f32.vlgmr.msra.gmra.mrb[0].mxu0 %v9971_v21  ;;  %v1111_v21 = vand.u32 4294901760, %v10090_v15 }
 0x10c   : > { %8597 = vmatpush3.bf16.msra.mxu0 %v9950_v12  ;;  %7861 = vmatprep.mubr.f32.mxu0 %v557_v27 }
 0x10d   : > { %8599 = vmatprep.subr.bf16.mxu0 %v9958_v16  ;;  %v1112_v29 = vsub.f32 %v10090_v15, %v1111_v21 }
 0x10f   : > { %v1113_v34 = vand.u32 4294901760, %v1112_v29 }
 0x110   : > { %8601 = vmatpush3.bf16.msra.mxu0 %v9958_v16 }
 0x111   : > { %8603 = vmatprep.subr.bf16.mxu0 %v8602_v2 }
 0x113   : > { %7862 = vmatmul.mubr.f32.vlgmr.msra.gmra.mrb[0].mxu0 %v567_v28 }
 0x114   : > { %8605 = vmatpush3.bf16.msra.mxu0 %v8602_v2  ;;  %7872 = vmatprep.mubr.f32.mxu0 %v9952_v13  ;;  %v1660_v2 = vsel %vm1652_vm1, %v473_v54, 0 }
 0x115   : > { %8607 = vmatprep.subr.bf16.mxu0 %v8606_v3 }
 0x118   : > { %8609 = vmatpush3.bf16.msra.mxu0 %v8606_v3  ;;  %v474_v3 = vld [vmem:[%s9938_s10 + $0x18] sm:$0xff] }
 0x119   : > { %8611 = vmatprep.subr.bf16.mxu0 %v9950_v12  ;;  %v1663_v17 = vsel %vm1652_vm1, %v474_v3, 0 }
 0x11b   : > { %7873 = vmatmul.mubr.f32.vlgmr.msra.gmra.mrb[0].mxu0 %v9954_v14 }
 0x11c   : > { %8613 = vmatpush3.bf16.msra.mxu0 %v9950_v12  ;;  %7883 = vmatprep.mubr.f32.mxu0 %v9952_v13  ;;  %v1156_v12 = vand.u32 4294901760, %v10083_v10  ;;  %v1163_v13 = vand.u32 4294901760, %v10086_v11 }
 0x11d   : > { %8615 = vmatprep.subr.bf16.mxu0 %v9958_v16 }
 0x11e   : > { %v1157_v27 = vsub.f32 %v10083_v10, %v1156_v12  ;;  %v1164_v28 = vsub.f32 %v10086_v11, %v1163_v13  ;;  %v8654_v47 = vpack.c.bf16 %v1163_v13, %v1156_v12  ;;  %v1741_v10 = vsub.f32 %v10161_v46, %v1740_v57 }
 0x11f   : > { %v1781_v11 = vand.u32 4294901760, %v10172_v58 }
 0x120   : > { %8617 = vmatpush3.bf16.msra.mxu0 %v9958_v16  ;;  %v1131_v16 = vand.u32 4294901760, %v10111_v22  ;;  %v1158_v32 = vand.u32 4294901760, %v1157_v27  ;;  %v1165_v33 = vand.u32 4294901760, %v1164_v28  ;;  %v1742_v25 = vand.u32 4294901760, %v1741_v10 }
 0x121   : > { %8619 = vmatprep.subr.bf16.mxu0 %v10016_v52  ;;  %v1782_v26 = vsub.f32 %v10172_v58, %v1781_v11  ;;  %v8698_v10 = vpack.c.bf16 %v10177_v0, %v10172_v58 }
 0x122   : > { %v8630_v36 = vpack.c.bf16 %v1165_v33, %v1158_v32 }
 0x123   : > { %7884 = vmatmul.mubr.f32.vlgmr.msra.gmra.mrb[0].mxu0 %v9954_v14  ;;  %v1132_v14 = vsub.f32 %v10111_v22, %v1131_v16  ;;  %v1783_v33 = vand.u32 4294901760, %v1782_v26 }
 0x124   : > { %8621 = vmatpush3.bf16.msra.mxu0 %v10016_v52  ;;  %7894 = vmatprep.mubr.f32.mxu0 %v1103_v23  ;;  %v10206_v23 = vsub.f32 %v1648_v56, %v1678_v5 }
 0x125   : > { %8623 = vmatprep.subr.bf16.mxu0 %v10023_v55  ;;  %v1133_v37 = vand.u32 4294901760, %v1132_v14 }
 0x128   : > { %8625 = vmatpush3.bf16.msra.mxu0 %v10023_v55 }
 0x129   : > { %8627 = vmatprep.subr.bf16.mxu0 %v8626_v31 }
 0x12b   : > { %7895 = vmatmul.mubr.f32.vlgmr.msra.gmra.mrb[2].mxu0 %v1113_v34  ;;  %v1809_v34 = vand.u32 4294901760, %v10206_v23 }
 0x12c   : > { %8629 = vmatpush3.bf16.msra.mxu0 %v8626_v31  ;;  %7897 = vmatprep.mubr.f32.mxu0 %v1123_v35 }
 0x12d   : > { %8631 = vmatprep.subr.bf16.mxu0 %v8630_v36 }
 0x12f   : > { %7898 = vmatmul.mubr.f32.gmra.mrb[4].mxu0 %v1133_v37 }
 0x130   : > { %8633 = vmatpush3.bf16.msra.mxu0 %v8630_v36  ;;  %7908 = vmatprep.mubr.f32.mxu0 %v10019_v53 }
 0x131   : > { %8635 = vmatprep.subr.bf16.mxu0 %v8634_v38 }
 0x133   : > { %7909 = vmatmul.mubr.f32.vlgmr.msra.gmra.mrb[2].mxu0 %v10038_v62 }
 0x134   : > { %8637 = vmatpush3.bf16.msra.mxu0 %v8634_v38  ;;  %7911 = vmatprep.mubr.f32.mxu0 %v10041_v63 }
 0x135   : > { %8639 = vmatprep.subr.bf16.mxu0 %v8638_v39 }
 0x137   : > { %7912 = vmatmul.mubr.f32.gmra.mrb[4].mxu0 %v10046_v1 }
 0x138   : > { %8641 = vmatpush3.bf16.msra.mxu0 %v8638_v39  ;;  %7922 = vmatprep.mubr.f32.mxu0 %v10068_v4  ;;  %v1649_v4 = vld [vmem:[#allocation11 + $0x28] sm:$0xff] }
 0x139   : > { %8643 = vmatprep.subr.bf16.mxu0 %v10016_v52  ;;  %v1681_v19 = vand.u32 4294901760, %v1649_v4 }
 0x13b   : > { %7923 = vmatmul.mubr.f32.vlgmr.msra.gmra.mrb[2].mxu0 %v10090_v15  ;;  %v10192_v15 = vand.u32 4294901760, %v1660_v2  ;;  %v10215_v27 = vsub.f32 %v1649_v4, %v1681_v19  ;;  %v10221_v28 = vpack.c.bf16 %v1681_v19, %v1678_v5 }
 0x13c   : > { %8645 = vmatpush3.bf16.msra.mxu0 %v10016_v52  ;;  %7925 = vmatprep.mubr.f32.mxu0 %v10098_v18  ;;  %v1647_v52 = vld [vmem:[#allocation11 + $0x18] sm:$0xff] }
 0x13d   : > { %8647 = vmatprep.subr.bf16.mxu0 %v10023_v55  ;;  %v1675_v61 = vand.u32 4294901760, %v1647_v52  ;;  %v1816_v14 = vand.u32 4294901760, %v10215_v27  ;;  %v8706_v19 = vpack.c.bf16 %v10215_v27, %v10206_v23 }
 0x13f   : > { %7926 = vmatmul.mubr.f32.gmra.mrb[4].mxu0 %v10111_v22  ;;  %v10199_v12 = vsub.f32 %v1647_v52, %v1675_v61  ;;  %v1817_v44 = vsub.f32 %v10215_v27, %v1816_v14 }
 0x140   : > { %8649 = vmatpush3.bf16.msra.mxu0 %v10023_v55  ;;  %7936 = vmatprep.mubr.f32.mxu0 %v1101_v7  ;;  %v1672_v55 = vand.u32 4294901760, %v1646_v50  ;;  %v1651_v7 = vld [vmem:[#allocation11 + $0x38] sm:$0xff] }
 0x141   : > { %8651 = vmatprep.subr.bf16.mxu0 %v8650_v43  ;;  %v1687_v13 = vand.u32 4294901760, %v1651_v7  ;;  %v1802_v29 = vand.u32 4294901760, %v10199_v12 }
 0x142   : > { %v10185_v9 = vsub.f32 %v1646_v50, %v1672_v55  ;;  %v10196_v18 = vpack.c.bf16 %v1675_v61, %v1672_v55 }
 0x143   : > { %7937 = vmatmul.mubr.f32.vlgmr.msra.gmra.mrb[2].mxu0 %v1111_v21  ;;  %v10203_v21 = vsub.f32 %v1657_v59, %v10183_v8  ;;  %v1803_v36 = vsub.f32 %v10199_v12, %v1802_v29  ;;  %v10247_v38 = vsub.f32 %v1651_v7, %v1687_v13  ;;  %v1818_v59 = vand.u32 4294901760, %v1817_v44 }
 0x144   : > { %8653 = vmatpush3.bf16.msra.mxu0 %v8650_v43  ;;  %7939 = vmatprep.mubr.f32.mxu0 %v1121_v24  ;;  %v1795_v22 = vand.u32 4294901760, %v10185_v9  ;;  %v10208_v24 = vand.u32 4294901760, %v1663_v17  ;;  %v1810_v43 = vsub.f32 %v10206_v23, %v1809_v34 }
 0x145   : > { %8655 = vmatprep.subr.bf16.mxu0 %v8654_v47  ;;  %v1750_v30 = vand.u32 4294901760, %v10203_v21  ;;  %v1804_v48 = vand.u32 4294901760, %v1803_v36  ;;  %v1830_v50 = vand.u32 4294901760, %v10247_v38 }
 0x146   : > { %v1796_v31 = vsub.f32 %v10185_v9, %v1795_v22  ;;  %v10235_v32 = vsub.f32 %v1663_v17, %v10208_v24  ;;  %v1811_v54 = vand.u32 4294901760, %v1810_v43  ;;  %v8702_v17 = vpack.c.bf16 %v10199_v12, %v10185_v9 }
 0x147   : > { %7940 = vmatmul.mubr.f32.gmra.mrb[4].mxu0 %v1131_v16  ;;  %v1751_v39 = vsub.f32 %v10203_v21, %v1750_v30 }
 0x148   : > { %8657 = vmatpush3.bf16.msra.mxu0 %v8654_v47  ;;  %7950 = vmatprep.mubr.f32.mxu0 %v10019_v53  ;;  %v1684_v53 = vand.u32 4294901760, %v1650_v6  ;;  %v1770_v40 = vand.u32 4294901760, %v10235_v32  ;;  %v1797_v41 = vand.u32 4294901760, %v1796_v31  ;;  %v8690_v4 = vpack.c.bf16 %v1818_v59, %v1811_v54 }
 0x149   : > { %8667 = vmatprep.subr.bf16.mxu0 %v10175_v60  ;;  %v1752_v51 = vand.u32 4294901760, %v1751_v39 }
 0x14a   : > { %v10228_v16 = vpack.c.bf16 %v1687_v13, %v1684_v53  ;;  %v10245_v37 = vsub.f32 %v1650_v6, %v1684_v53  ;;  %v1771_v52 = vsub.f32 %v10235_v32, %v1770_v40  ;;  %v8686_v56 = vpack.c.bf16 %v1804_v48, %v1797_v41 }
 0x14b   : > { %7951 = vmatmul.mubr.f32.vlgmr.msra.gmra.mrb[2].mxu0 %v10038_v62  ;;  %v10218_v62 = vsub.f32 %v1660_v2, %v10192_v15  ;;  %v1831_v2 = vsub.f32 %v10247_v38, %v1830_v50  ;;  %v8730_v13 = vpack.c.bf16 %v1788_v20, %v1781_v11 }
 0x14c   : > { %7953 = vmatprep.mubr.f32.mxu0 %v10041_v63  ;;  %8669 = vmatpush3.bf16.msra.mxu0 %v10175_v60  ;;  %v1789_v63 = vsub.f32 %v10177_v0, %v1788_v20  ;;  %v1823_v49 = vand.u32 4294901760, %v10245_v37  ;;  %v1772_v3 = vand.u32 4294901760, %v1771_v52  ;;  %v8710_v53 = vpack.c.bf16 %v10247_v38, %v10245_v37 }
 0x14d   : > { %8671 = vmatprep.subr.bf16.mxu0 %v10196_v18  ;;  %v1832_v6 = vand.u32 4294901760, %v1831_v2  ;;  %v9566_v0 = vmov 0.0|0.0  }
 0x14e   : > { %v1790_v35 = vand.u32 4294901760, %v1789_v63  ;;  %v1824_v61 = vsub.f32 %v10245_v37, %v1823_v49  ;;  %v8742_v58 = vpack.c.bf16 %v1830_v50, %v1823_v49  ;;  %8765 = vmatprep.subr.bf16.mxu1 %v9566_v0 }
 0x14f   : > { %7954 = vmatmul.mubr.f32.gmra.mrb[4].mxu0 %v10046_v1  ;;  %v1760_v1 = vand.u32 4294901760, %v10218_v62 }
 0x150   : > { %8673 = vmatpush3.bf16.msra.mxu0 %v10196_v18  ;;  %7986 = vmatprep.mubr.f32.mxu0 %v1742_v25  ;;  %v8682_v47 = vpack.c.bf16 %v1790_v35, %v1783_v33  ;;  %v1825_v5 = vand.u32 4294901760, %v1824_v61 }
 0x151   : > { %8675 = vmatprep.subr.bf16.mxu0 %v10221_v28  ;;  %v1761_v45 = vsub.f32 %v10218_v62, %v1760_v1 }
 0x152   : > { %v8694_v7 = vpack.c.bf16 %v1832_v6, %v1825_v5 }
 0x153   : > { %v1762_v55 = vand.u32 4294901760, %v1761_v45 }
 0x154   : > { %8677 = vmatpush3.bf16.msra.mxu0 %v10221_v28 }
 0x155   : > { %8679 = vmatprep.subr.bf16.mxu0 %v10228_v16 }
 0x158   : > { %8681 = vmatpush3.bf16.msra.mxu0 %v10228_v16 }
 0x159   : > { %8683 = vmatprep.subr.bf16.mxu0 %v8682_v47 }
 0x15b   : > { %7987 = vmatmul.mubr.f32.vlgmr.msra.gmra.mrb[6].mxu0 %v1752_v51 }
 0x15c   : > { %8685 = vmatpush3.bf16.msra.mxu0 %v8682_v47  ;;  %7989 = vmatprep.mubr.f32.mxu0 %v1762_v55 }
 0x15d   : > { %8687 = vmatprep.subr.bf16.mxu0 %v8686_v56 }
 0x15f   : > { %7990 = vmatmul.mubr.f32.gmra.mrb[8].mxu0 %v1772_v3 }
 0x160   : > { %8689 = vmatpush3.bf16.msra.mxu0 %v8686_v56  ;;  %8008 = vmatprep.mubr.f32.mxu0 %v10149_v42 }
 0x161   : > { %8691 = vmatprep.subr.bf16.mxu0 %v8690_v4 }
 0x164   : > { %8693 = vmatpush3.bf16.msra.mxu0 %v8690_v4 }
 0x165   : > { %8695 = vmatprep.subr.bf16.mxu0 %v8694_v7 }
 0x168   : > { %8697 = vmatpush3.bf16.msra.mxu0 %v8694_v7 }
 0x169   : > { %8699 = vmatprep.subr.bf16.mxu0 %v8698_v10 }
 0x16b   : > { %8009 = vmatmul.mubr.f32.vlgmr.msra.gmra.mrb[6].mxu0 %v10183_v8 }
 0x16c   : > { %8701 = vmatpush3.bf16.msra.mxu0 %v8698_v10  ;;  %8011 = vmatprep.mubr.f32.mxu0 %v10192_v15 }
 0x16d   : > { %8703 = vmatprep.subr.bf16.mxu0 %v8702_v17 }
 0x16f   : > { %8012 = vmatmul.mubr.f32.gmra.mrb[8].mxu0 %v10208_v24 }
 0x170   : > { %8705 = vmatpush3.bf16.msra.mxu0 %v8702_v17  ;;  %8030 = vmatprep.mubr.f32.mxu0 %v10161_v46  ;;  %v8734_v46 = vpack.c.bf16 %v1802_v29, %v1795_v22 }
 0x171   : > { %8707 = vmatprep.subr.bf16.mxu0 %v8706_v19 }
 0x174   : > { %8709 = vmatpush3.bf16.msra.mxu0 %v8706_v19 }
 0x175   : > { %8711 = vmatprep.subr.bf16.mxu0 %v8710_v53 }
 0x178   : > { %8713 = vmatpush3.bf16.msra.mxu0 %v8710_v53 }
 0x179   : > { %8715 = vmatprep.subr.bf16.mxu0 %v10175_v60 }
 0x17b   : > { %8031 = vmatmul.mubr.f32.vlgmr.msra.gmra.mrb[6].mxu0 %v10203_v21 }
 0x17c   : > { %8717 = vmatpush3.bf16.msra.mxu0 %v10175_v60  ;;  %8033 = vmatprep.mubr.f32.mxu0 %v10218_v62 }
 0x17d   : > { %8719 = vmatprep.subr.bf16.mxu0 %v10196_v18 }
 0x17f   : > { %8034 = vmatmul.mubr.f32.gmra.mrb[8].mxu0 %v10235_v32 }
 0x180   : > { %8721 = vmatpush3.bf16.msra.mxu0 %v10196_v18  ;;  %8052 = vmatprep.mubr.f32.mxu0 %v1740_v57  ;;  %v8738_v57 = vpack.c.bf16 %v1816_v14, %v1809_v34 }
 0x181   : > { %8723 = vmatprep.subr.bf16.mxu0 %v10221_v28 }
 0x184   : > { %8725 = vmatpush3.bf16.msra.mxu0 %v10221_v28 }
 0x185   : > { %8727 = vmatprep.subr.bf16.mxu0 %v10228_v16 }
 0x188   : > { %8729 = vmatpush3.bf16.msra.mxu0 %v10228_v16 }
 0x189   : > { %8731 = vmatprep.subr.bf16.mxu0 %v8730_v13 }
 0x18b   : > { %8053 = vmatmul.mubr.f32.vlgmr.msra.gmra.mrb[6].mxu0 %v1750_v30 }
 0x18c   : > { %8733 = vmatpush3.bf16.msra.mxu0 %v8730_v13  ;;  %8055 = vmatprep.mubr.f32.mxu0 %v1760_v1 }
 0x18d   : > { %8735 = vmatprep.subr.bf16.mxu0 %v8734_v46 }
 0x18f   : > { %8056 = vmatmul.mubr.f32.gmra.mrb[8].mxu0 %v1770_v40 }
 0x190   : > { %8737 = vmatpush3.bf16.msra.mxu0 %v8734_v46  ;;  %8074 = vmatprep.mubr.f32.mxu0 %v10149_v42 }
 0x191   : > { %8739 = vmatprep.subr.bf16.mxu0 %v8738_v57 }
 0x194   : > { %8741 = vmatpush3.bf16.msra.mxu0 %v8738_v57 }
 0x195   : > { %8743 = vmatprep.subr.bf16.mxu0 %v8742_v58 }
 0x198   : > { %8745 = vmatpush3.bf16.msra.mxu0 %v8742_v58 }
 0x199   : > { %8747 = vmatprep.subr.bf16.mxu0 %v10175_v60 }
 0x19b   : > { %8075 = vmatmul.mubr.f32.vlgmr.msra.gmra.mrb[6].mxu0 %v10183_v8 }
 0x19c   : > { %8749 = vmatpush3.bf16.msra.mxu0 %v10175_v60  ;;  %8077 = vmatprep.mubr.f32.mxu0 %v10192_v15  ;;  %v9568_v60 = vmov 0.0  }
 0x19d   : > { %8751 = vmatprep.subr.bf16.mxu0 %v10196_v18  ;;  %8113 = vmatprep.mubr.msk.f32.mxu1 %vm9567_vm2, %v9568_v60 }
 0x19f   : > { %8078 = vmatmul.mubr.f32.gmra.mrb[8].mxu0 %v10208_v24 }
 0x1a0   : > { %8753 = vmatpush3.bf16.msra.mxu0 %v10196_v18  ;;  %8096 = vmatprep.mubr.f32.mxu0 %v10149_v42 }
 0x1a1   : > { %8755 = vmatprep.subr.bf16.mxu0 %v10221_v28 }
 0x1a4   : > { %8757 = vmatpush3.bf16.msra.mxu0 %v10221_v28 }
 0x1a5   : > { %8759 = vmatprep.subr.bf16.mxu0 %v10228_v16 }
 0x1a8   : > { %8761 = vmatpush3.bf16.msra.mxu0 %v10228_v16 }
 0x1a9   : > { %8762 = vmatprep.subr.bf16.mxu0 %v9566_v0 }
 0x1ab   : > { %8097 = vmatmul.mubr.f32.vlgmr.msra.gmra.mrb[6].mxu0 %v10183_v8 }
 0x1ac   : > { %8099 = vmatprep.mubr.f32.mxu0 %v10192_v15 }
 0x1af   : > { %8100 = vmatmul.mubr.f32.gmra.mrb[8].mxu0 %v10208_v24 }
 0x1b0   : > { %8106 = vmatprep.mubr.msk.f32.mxu0 %vm9567_vm2, %v9568_v60 }
 0x1d3   : > { %v7966_v42 = vpop.f32.mrb[0].mxu1 }
 0x1d4   : > { %v1622_v9 = vpop.f32.mrb[1].mxu1 }
 0x1d8   : > { %v7969_v11 = vpop.f32.mrb[2].mxu1 }
 0x1d9   : > { %v1634_v18 = vpop.f32.mrb[3].mxu1 }
 0x1f6   : > { %v10346_v20 = vpop.f32.mrb[0].mxu0 }
 0x1f7   : > { %v1004_v12 = vpop.f32.mrb[1].mxu0  ;;  %v2810_v6 = vsel %vm2340_vm3, %v10346_v20, 0 }
 0x1f8   : > { %4241 = vrot.lane.b32.xlu1 %v1004_v12, %s9569_s11  ;;  %v2342_v8 = vsel %vm2340_vm3, %v1004_v12, 0  ;;  %v2885_v7 = vand.u32 4294901760, %v2810_v6 }
 0x1f9   : > { %v10350_v15 = vand.u32 4294901760, %v2342_v8 }
 0x1fa   : > { %v2886_v10 = vsub.f32 %v2810_v6, %v2885_v7 }
 0x1fb   : > { %v2418_v24 = vsub.f32 %v2342_v8, %v10350_v15 }
 0x1fc   : > { %v2887_v17 = vand.u32 4294901760, %v2886_v10 }
 0x1fd   : > { %v2419_v30 = vand.u32 4294901760, %v2418_v24 }
 0x1fe   : > { %v2888_v19 = vsub.f32 %v2886_v10, %v2887_v17 }
 0x1ff   : > { %v2420_v40 = vsub.f32 %v2418_v24, %v2419_v30 }
 0x200   : > { %v2889_v53 = vand.u32 4294901760, %v2888_v19 }
 0x201   : > { %v2421_v55 = vand.u32 4294901760, %v2420_v40 }
 0x21e   : > { %v7952_v21 = vpop.f32.mrb[2].mxu0 }
 0x21f   : > { %v9002_v22 = vadd.f32 %v7966_v42, %v7952_v21  ;;  %v1529_v23 = vpop.f32.mrb[3].mxu0 }
 0x220   : > { %v9003_v25 = vadd.f32 %v1622_v9, %v1529_v23 }
 0x221   : > { %v2348_v26 = vsel %vm2340_vm3, %v9002_v22, 0  ;;  %4245 = vrot.lane.b32.xlu0 %v9002_v22, %s9569_s11 }
 0x222   : > { %v2354_v27 = vand.u32 4294901760, %v2348_v26  ;;  %v2345_v62 = vsel %vm2340_vm3, %v9003_v25, 0  ;;  %v7955_v28 = vpop.f32.mrb[4].mxu0 }
 0x223   : > { %v2351_v63 = vand.u32 4294901760, %v2345_v62  ;;  %v9004_v29 = vadd.f32 %v7969_v11, %v7955_v28  ;;  %v1541_v16 = vpop.f32.mrb[5].mxu0 }
 0x224   : > { %v2436_v31 = vsub.f32 %v2348_v26, %v2354_v27  ;;  %v9005_v32 = vadd.f32 %v1634_v18, %v1541_v16 }
 0x225   : > { %v8763_v33 = vpack.c.bf16 %v2354_v27, %v2351_v63  ;;  %v2429_v34 = vsub.f32 %v2345_v62, %v2351_v63  ;;  %v2816_v14 = vsel %vm2340_vm3, %v9004_v29, 0  ;;  %4243 = vrot.lane.b32.xlu0 %v9003_v25, %s9569_s11 }
 0x226   : > { %v2437_v1 = vand.u32 4294901760, %v2436_v31  ;;  %v2822_v35 = vand.u32 4294901760, %v2816_v14  ;;  %v2813_v36 = vsel %vm2340_vm3, %v9005_v32, 0  ;;  %4714 = vrot.lane.b32.xlu1 %v9005_v32, %s9569_s11 }
 0x227   : > { %v2430_v37 = vand.u32 4294901760, %v2429_v34  ;;  %v2819_v38 = vand.u32 4294901760, %v2813_v36  ;;  %8764 = vmatpush3.bf16.xpose.msra.mxu0 %v8763_v33  ;;  %v8769_v39 = vpack.c.bf16 %v2436_v31, %v2429_v34 }
 0x228   : > { %v2438_v41 = vsub.f32 %v2436_v31, %v2437_v1  ;;  %v2904_v43 = vsub.f32 %v2816_v14, %v2822_v35  ;;  %8816 = vmatprep.subr.bf16.mxu0 %v9566_v0 }
 0x229   : > { %v2431_v44 = vsub.f32 %v2429_v34, %v2430_v37  ;;  %v10361_v45 = vpack.c.bf16 %v2822_v35, %v2819_v38  ;;  %v2897_v47 = vsub.f32 %v2813_v36, %v2819_v38  ;;  %4716 = vrot.lane.b32.xlu0 %v9004_v29, %s9569_s11  ;;  %v8775_v48 = vpack.c.bf16 %v2437_v1, %v2430_v37 }
 0x22a   : > { %v2439_v49 = vand.u32 4294901760, %v2438_v41  ;;  %v2905_v50 = vand.u32 4294901760, %v2904_v43  ;;  %4712 = vrot.lane.b32.xlu1 %v10346_v20, %s9569_s11 }
 0x22b   : > { %v2432_v51 = vand.u32 4294901760, %v2431_v44  ;;  %v2898_v52 = vand.u32 4294901760, %v2897_v47  ;;  %v8787_v54 = vpack.c.bf16 %v2904_v43, %v2897_v47 }
 0x22c   : > { %v2906_v56 = vsub.f32 %v2904_v43, %v2905_v50 }
 0x22d   : > { %v2899_v59 = vsub.f32 %v2897_v47, %v2898_v52  ;;  %v8766_v61 = vpack.c.bf16 %v2439_v49, %v2432_v51  ;;  %v8793_v2 = vpack.c.bf16 %v2905_v50, %v2898_v52 }
 0x22e   : > { %v2907_v3 = vand.u32 4294901760, %v2906_v56  ;;  %8107 = vmatmul.mubr.f32.vlgmr.msra.gmra.mrb[10].mxu0 %v2421_v55 }
 0x22f   : > { %v2900_v4 = vand.u32 4294901760, %v2899_v59  ;;  %8767 = vmatpush3.bf16.xpose.msra.mxu1 %v8766_v61  ;;  %8232 = vmatprep.mubr.msk.f32.mxu0 %vm9567_vm2, %v9568_v60 }
 0x230   : > { %8768 = vmatprep.subr.bf16.mxu1 %v9566_v0 }
 0x231   : > { %v8784_v5 = vpack.c.bf16 %v2907_v3, %v2900_v4 }
 0x236   : > { %8114 = vmatmul.mubr.f32.vlgmr.msra.gmra.mrb[4].mxu1 %v10350_v15 }
 0x237   : > { %8770 = vmatpush3.bf16.xpose.msra.mxu1 %v8769_v39  ;;  %8120 = vmatprep.mubr.msk.f32.mxu1 %vm9567_vm2, %v9568_v60 }
 0x238   : > { %8771 = vmatprep.subr.bf16.mxu1 %v9566_v0 }
 0x23e   : > { %8121 = vmatmul.mubr.f32.vlgmr.msra.gmra.mrb[4].mxu1 %v2418_v24 }
 0x23f   : > { %8773 = vmatpush3.bf16.xpose.msra.mxu1 %v8763_v33  ;;  %8127 = vmatprep.mubr.msk.f32.mxu1 %vm9567_vm2, %v9568_v60 }
 0x240   : > { %8774 = vmatprep.subr.bf16.mxu1 %v9566_v0 }
 0x246   : > { %8128 = vmatmul.mubr.f32.vlgmr.msra.gmra.mrb[4].mxu1 %v2419_v30 }
 0x247   : > { %8776 = vmatpush3.bf16.xpose.msra.mxu1 %v8775_v48  ;;  %8134 = vmatprep.mubr.msk.f32.mxu1 %vm9567_vm2, %v9568_v60 }
 0x248   : > { %8777 = vmatprep.subr.bf16.mxu1 %v9566_v0 }
 0x24e   : > { %8135 = vmatmul.mubr.f32.vlgmr.msra.gmra.mrb[4].mxu1 %v10350_v15 }
 0x24f   : > { %8779 = vmatpush3.bf16.xpose.msra.mxu1 %v8763_v33  ;;  %8141 = vmatprep.mubr.msk.f32.mxu1 %vm9567_vm2, %v9568_v60 }
 0x250   : > { %8780 = vmatprep.subr.bf16.mxu1 %v9566_v0 }
 0x256   : > { %8142 = vmatmul.mubr.f32.vlgmr.msra.gmra.mrb[4].mxu1 %v10350_v15 }
 0x257   : > { %8782 = vmatpush3.bf16.xpose.msra.mxu1 %v10361_v45  ;;  %8148 = vmatprep.mubr.msk.f32.mxu1 %vm9567_vm2, %v9568_v60 }
 0x258   : > { %8783 = vmatprep.subr.bf16.mxu1 %v9566_v0 }
 0x25e   : > { %8149 = vmatmul.mubr.f32.vlgmr.msra.gmra.mrb[6].mxu1 %v2889_v53 }
 0x25f   : > { %8785 = vmatpush3.bf16.xpose.msra.mxu1 %v8784_v5  ;;  %8155 = vmatprep.mubr.msk.f32.mxu1 %vm9567_vm2, %v9568_v60 }
 0x260   : > { %8786 = vmatprep.subr.bf16.mxu1 %v9566_v0 }
 0x266   : > { %8156 = vmatmul.mubr.f32.vlgmr.msra.gmra.mrb[6].mxu1 %v2885_v7 }
 0x267   : > { %8788 = vmatpush3.bf16.xpose.msra.mxu1 %v8787_v54  ;;  %8162 = vmatprep.mubr.msk.f32.mxu1 %vm9567_vm2, %v9568_v60 }
 0x268   : > { %8789 = vmatprep.subr.bf16.mxu1 %v9566_v0 }
 0x26a   : > { %v10447_v37 = vpop.permute.xlu1 %4241 }
 0x26e   : > { %8163 = vmatmul.mubr.f32.vlgmr.msra.gmra.mrb[6].mxu1 %v2886_v10 }
 0x26f   : > { %8791 = vmatpush3.bf16.xpose.msra.mxu1 %v10361_v45  ;;  %8169 = vmatprep.mubr.msk.f32.mxu1 %vm9567_vm2, %v9568_v60 }
 0x270   : > { %8792 = vmatprep.subr.bf16.mxu1 %v9566_v0 }
 0x276   : > { %8170 = vmatmul.mubr.f32.vlgmr.msra.gmra.mrb[6].mxu1 %v2887_v17 }
 0x277   : > { %8794 = vmatpush3.bf16.xpose.msra.mxu1 %v8793_v2  ;;  %8176 = vmatprep.mubr.msk.f32.mxu1 %vm9567_vm2, %v9568_v60 }
 0x278   : > { %8795 = vmatprep.subr.bf16.mxu1 %v9566_v0 }
 0x27e   : > { %8177 = vmatmul.mubr.f32.vlgmr.msra.gmra.mrb[6].mxu1 %v2885_v7  ;;  %v8098_v13 = vpop.f32.mrb[6].mxu0 }
 0x27f   : > { %8797 = vmatpush3.bf16.xpose.msra.mxu1 %v10361_v45  ;;  %8183 = vmatprep.mubr.msk.f32.mxu1 %vm9567_vm2, %v9568_v60  ;;  %v3324_v46 = vand.u32 4294901760, %v8098_v13  ;;  %v2309_v57 = vpop.f32.mrb[7].mxu0 }
 0x280   : > { %v3321_v58 = vand.u32 4294901760, %v2309_v57  ;;  %5225 = vrot.lane.b32.xlu0 %v2309_v57, %s9570_s12  ;;  %5227 = vrot.lane.b32.xlu1 %v8098_v13, %s9570_s12 }
 0x281   : > { %v10406_v42 = vsub.f32 %v8098_v13, %v3324_v46  ;;  %8798 = vmatprep.subr.bf16.mxu1 %v9566_v0 }
 0x282   : > { %v10409_v9 = vpack.c.bf16 %v3324_v46, %v3321_v58  ;;  %v10411_v11 = vsub.f32 %v2309_v57, %v3321_v58  ;;  %v8101_v18 = vpop.f32.mrb[8].mxu0 }
 0x283   : > { %v3407_v20 = vand.u32 4294901760, %v10406_v42  ;;  %v3786_v12 = vand.u32 4294901760, %v8101_v18  ;;  %v2321_v8 = vpop.f32.mrb[9].mxu0 }
 0x284   : > { %v3400_v15 = vand.u32 4294901760, %v10411_v11  ;;  %v3783_v21 = vand.u32 4294901760, %v2321_v8  ;;  %5695 = vrot.lane.b32.xlu0 %v2321_v8, %s9570_s12  ;;  %5697 = vrot.lane.b32.xlu1 %v8101_v18, %s9570_s12  ;;  %v8805_v22 = vpack.c.bf16 %v10406_v42, %v10411_v11 }
 0x285   : > { %v3408_v23 = vsub.f32 %v10406_v42, %v3407_v20  ;;  %v10418_v24 = vsub.f32 %v8101_v18, %v3786_v12 }
 0x286   : > { %8184 = vmatmul.mubr.f32.vlgmr.msra.gmra.mrb[6].mxu1 %v2885_v7  ;;  %v3401_v25 = vsub.f32 %v10411_v11, %v3400_v15  ;;  %v10421_v26 = vpack.c.bf16 %v3786_v12, %v3783_v21  ;;  %v10423_v27 = vsub.f32 %v2321_v8, %v3783_v21  ;;  %v10425_v62 = vpack.c.bf16 %v3407_v20, %v3400_v15 }
 0x287   : > { %v3409_v28 = vand.u32 4294901760, %v3408_v23  ;;  %v3869_v63 = vand.u32 4294901760, %v10418_v24  ;;  %8800 = vmatpush3.bf16.msra.mxu1 %v10409_v9  ;;  %8190 = vmatprep.mubr.msk.f32.mxu1 %vm9567_vm2, %v9568_v60 }
 0x288   : > { %v3402_v29 = vand.u32 4294901760, %v3401_v25  ;;  %v3862_v16 = vand.u32 4294901760, %v10423_v27  ;;  %8818 = vmatpush3.bf16.msra.mxu0 %v10421_v26  ;;  %8801 = vmatprep.subr.bf16.mxu1 %v9566_v0  ;;  %v8823_v33 = vpack.c.bf16 %v10418_v24, %v10423_v27 }
 0x289   : > { %v3870_v30 = vsub.f32 %v10418_v24, %v3869_v63  ;;  %8819 = vmatprep.subr.bf16.mxu0 %v9566_v0 }
 0x28a   : > { %v3863_v31 = vsub.f32 %v10423_v27, %v3862_v16  ;;  %v10437_v32 = vpack.c.bf16 %v3409_v28, %v3402_v29  ;;  %v10441_v1 = vpack.c.bf16 %v3869_v63, %v3862_v16 }
 0x28b   : > { %v3871_v34 = vand.u32 4294901760, %v3870_v30 }
 0x28c   : > { %v3864_v14 = vand.u32 4294901760, %v3863_v31 }
 0x28e   : > { %v10443_v35 = vpack.c.bf16 %v3871_v34, %v3864_v14 }
 0x293   : > { %v10445_v36 = vpop.permute.xlu0 %4245 }
 0x297   : > { %v10449_v38 = vpop.permute.xlu0 %4243 }
 0x298   : > { %v10451_v39 = vpop.permute.xlu1 %4714  ;;  %v4249_v11 = vsel %vm2340_vm3, %v10449_v38, 0 }
 0x29b   : > { %v10453_v40 = vpop.permute.xlu0 %4716 }
 0x29c   : > { %v10455_v41 = vpop.permute.xlu1 %4712  ;;  %v4722_v24 = vsel %vm2340_vm3, %v10453_v40, 0 }
 0x2f2   : > { %v10457_v43 = vpop.permute.xlu0 %5225  ;;  %v10459_v44 = vpop.permute.xlu1 %5227 }
 0x2f3   : > { %v5235_v45 = vand.u32 4294901760, %v10457_v43  ;;  %v5238_v47 = vand.u32 4294901760, %v10459_v44 }
 0x2f5   : > { %v10466_v48 = vsub.f32 %v10457_v43, %v5235_v45  ;;  %v10471_v49 = vsub.f32 %v10459_v44, %v5238_v47 }
 0x2f6   : > { %v10473_v50 = vpop.permute.xlu0 %5695  ;;  %v10475_v51 = vpop.permute.xlu1 %5697 }
 0x2f7   : > { %v5314_v52 = vand.u32 4294901760, %v10466_v48  ;;  %v5321_v54 = vand.u32 4294901760, %v10471_v49  ;;  %v8877_v55 = vpack.c.bf16 %v10471_v49, %v10466_v48  ;;  %v5705_v56 = vand.u32 4294901760, %v10473_v50 }
 0x2f8   : > { %v5708_v59 = vand.u32 4294901760, %v10475_v51 }
 0x2f9   : > { %v5315_v61 = vsub.f32 %v10466_v48, %v5314_v52  ;;  %v5322_v2 = vsub.f32 %v10471_v49, %v5321_v54  ;;  %v10488_v3 = vsub.f32 %v10473_v50, %v5705_v56  ;;  %v10490_v4 = vpack.c.bf16 %v5321_v54, %v5314_v52 }
 0x2fa   : > { %v10495_v5 = vsub.f32 %v10475_v51, %v5708_v59 }
 0x2fb   : > { %v5316_v6 = vand.u32 4294901760, %v5315_v61  ;;  %v5323_v7 = vand.u32 4294901760, %v5322_v2  ;;  %v5784_v10 = vand.u32 4294901760, %v10488_v3 }
 0x2fc   : > { %v5791_v17 = vand.u32 4294901760, %v10495_v5  ;;  %v8895_v53 = vpack.c.bf16 %v10495_v5, %v10488_v3 }
 0x2fd   : > { %v5785_v19 = vsub.f32 %v10488_v3, %v5784_v10  ;;  %v10502_v13 = vpack.c.bf16 %v5323_v7, %v5316_v6  ;;  %v2335_v3 = vld [vmem:[#allocation13 + $0x20] sm:$0xff] }
 0x2fe   : > { %v5792_v46 = vsub.f32 %v10495_v5, %v5791_v17  ;;  %v10505_v58 = vpack.c.bf16 %v5791_v17, %v5784_v10  ;;  %v2336_v5 = vld [vmem:[#allocation13 + $0x28] sm:$0xff] }
 0x2ff   : > { %v5786_v57 = vand.u32 4294901760, %v5785_v19 }
 0x300   : > { %v5793_v18 = vand.u32 4294901760, %v5792_v46 }
 0x301   : > { %v2423_v20 = vpop.f32.mrb[10].mxu0 }
 0x302   : > { %v8108_v12 = vpop.f32.mrb[11].mxu0  ;;  %v10507_v8 = vpack.c.bf16 %v5793_v18, %v5786_v57 }
 0x329   : > { %v2805_v15 = vpop.f32.mrb[4].mxu1 }
 0x32a   : > { %v9006_v21 = vadd.f32 %v2805_v15, %v2423_v20  ;;  %v8143_v23 = vpop.f32.mrb[5].mxu1 }
 0x32c   : > { %v3277_v25 = vmul.f32 0.25, %v9006_v21 }
 0x32e   : > { %v3279_v28 = vsel %vm2340_vm3, %v3277_v25, -inf }
 0x32f   : > { %v3280_v63 = vrot.slane %v3279_v28, 4 }
 0x331   : > { %v3281_v29 = vmax.f32 %v3279_v28, %v3280_v63 }
 0x333   : > { %v3282_v16 = vrot.slane %v3281_v29, 2 }
 0x335   : > { %v3283_v30 = vmax.f32 %v3281_v29, %v3282_v16 }
 0x337   : > { %v3284_v31 = vrot.slane %v3283_v30, 1 }
 0x339   : > { %v3285_v34 = vmax.f32 %v3283_v30, %v3284_v31 }
 0x33b   : > { %v3293_v14 = vsub.f32 %v3277_v25, %v3285_v34 }
 0x33d   : > { %v3295_v52 = vmul.f32 1.442695, %v3293_v14 }
 0x33f   : > { %9259 = vpow2.f32 %v3295_v52 }
 0x349   : > { %v9260_v54 = vpop.eup %9259 }
 0x34a   : > { %v3299_v61 = vsel %vm2340_vm3, %v9260_v54, 0.0 }
 0x34b   : > { %v3300_v2 = vrot.slane %v3299_v61, 4 }
 0x34d   : > { %v3301_v6 = vadd.f32 %v3300_v2, %v3299_v61 }
 0x34f   : > { %v3302_v7 = vrot.slane %v3301_v6, 2 }
 0x351   : > { %v3303_v10 = vadd.f32 %v3302_v7, %v3301_v6 }
 0x353   : > { %v3304_v17 = vrot.slane %v3303_v10, 1 }
 0x355   : > { %v3305_v19 = vadd.f32 %v3304_v17, %v3303_v10 }
 0x357   : > { %9261 = vrcp.f32 %v3305_v19 }
 0x359   : > { %v3273_v46 = vpop.f32.mrb[6].mxu1 }
 0x35a   : > { %v3278_v57 = vmul.f32 0.25, %v3273_v46  ;;  %v8185_v18 = vpop.f32.mrb[7].mxu1  ;;  %v4247_v46 = vsel %vm2340_vm3, %v10447_v37, 0 }
 0x35c   : > { %v3286_v20 = vsel %vm2340_vm3, %v3278_v57, -inf }
 0x35d   : > { %v3287_v12 = vrot.slane %v3286_v20, 4 }
 0x35f   : > { %v3288_v15 = vmax.f32 %v3286_v20, %v3287_v12  ;;  %v10538_v20 = vand.u32 4294901760, %v4247_v46 }
 0x361   : > { %v9262_v21 = vpop.eup %9261  ;;  %v3289_v23 = vrot.slane %v3288_v15, 2 }
 0x362   : > { %v3314_v25 = vmul.f32 %v9262_v21, %v9260_v54 }
 0x363   : > { %v3290_v28 = vmax.f32 %v3288_v15, %v3289_v23 }
 0x364   : > { %v3318_v63 = vsel %vm2340_vm3, %v3314_v25, 0 }
 0x365   : > { %v3291_v29 = vrot.slane %v3290_v28, 1  ;;  %v3387_v16 = vand.u32 4294901760, %v3318_v63 }
 0x367   : > { %v3292_v30 = vmax.f32 %v3290_v28, %v3291_v29  ;;  %v3388_v31 = vsub.f32 %v3318_v63, %v3387_v16 }
 0x369   : > { %v3294_v34 = vsub.f32 %v3278_v57, %v3292_v30  ;;  %v3389_v14 = vand.u32 4294901760, %v3388_v31  ;;  %v4254_v57 = vand.u32 4294901760, %v4249_v11 }
 0x36b   : > { %v3297_v52 = vmul.f32 1.442695, %v3294_v34  ;;  %v3390_v61 = vsub.f32 %v3388_v31, %v3389_v14  ;;  %v4332_v15 = vsub.f32 %v4249_v11, %v4254_v57 }
 0x36d   : > { %9263 = vpow2.f32 %v3297_v52  ;;  %v3391_v2 = vand.u32 4294901760, %v3390_v61  ;;  %v4333_v21 = vand.u32 4294901760, %v4332_v15 }
 0x36f   : > { %8191 = vmatmul.mubr.f32.vlgmr.msra.gmra.mrb[8].mxu1 %v3391_v2 }
 0x370   : > { %8803 = vmatpush3.bf16.msra.mxu1 %v10437_v32  ;;  %8197 = vmatprep.mubr.msk.f32.mxu1 %vm9567_vm2, %v9568_v60 }
 0x371   : > { %8804 = vmatprep.subr.bf16.mxu1 %v9566_v0 }
 0x377   : > { %v9264_v54 = vpop.eup %9263  ;;  %8198 = vmatmul.mubr.f32.vlgmr.msra.gmra.mrb[8].mxu1 %v3387_v16 }
 0x378   : > { %v3306_v6 = vsel %vm2340_vm3, %v9264_v54, 0.0  ;;  %8806 = vmatpush3.bf16.msra.mxu1 %v8805_v22  ;;  %8204 = vmatprep.mubr.msk.f32.mxu1 %vm9567_vm2, %v9568_v60  ;;  %v4251_v22 = vsel %vm2340_vm3, %v10445_v36, 0  ;;  %v4321_v36 = vsub.f32 %v4247_v46, %v10538_v20 }
 0x379   : > { %v3307_v7 = vrot.slane %v3306_v6, 4  ;;  %8807 = vmatprep.subr.bf16.mxu1 %v9566_v0  ;;  %v4257_v18 = vand.u32 4294901760, %v4251_v22 }
 0x37a   : > { %v4322_v63 = vand.u32 4294901760, %v4321_v36 }
 0x37b   : > { %v3308_v32 = vadd.f32 %v3307_v7, %v3306_v6  ;;  %v10549_v29 = vpack.c.bf16 %v4257_v18, %v4254_v57  ;;  %v4728_v6 = vand.u32 4294901760, %v4722_v24  ;;  %v4718_v7 = vsel %vm2340_vm3, %v10455_v41, 0 }
 0x37c   : > { %v4791_v40 = vand.u32 4294901760, %v4718_v7 }
 0x37d   : > { %v3309_v10 = vrot.slane %v3308_v32, 2 }
 0x37e   : > { %v4792_v41 = vsub.f32 %v4718_v7, %v4791_v40 }
 0x37f   : > { %v3310_v17 = vadd.f32 %v3309_v10, %v3308_v32  ;;  %8205 = vmatmul.mubr.f32.vlgmr.msra.gmra.mrb[8].mxu1 %v3388_v31  ;;  %v4810_v32 = vsub.f32 %v4722_v24, %v4728_v6 }
 0x380   : > { %8809 = vmatpush3.bf16.msra.mxu1 %v10409_v9  ;;  %8211 = vmatprep.mubr.msk.f32.mxu1 %vm9567_vm2, %v9568_v60 }
 0x381   : > { %v3311_v19 = vrot.slane %v3310_v17, 1  ;;  %8810 = vmatprep.subr.bf16.mxu1 %v9566_v0  ;;  %v4811_v10 = vand.u32 4294901760, %v4810_v32 }
 0x383   : > { %v3312_v42 = vadd.f32 %v3311_v19, %v3310_v17  ;;  %v4793_v19 = vand.u32 4294901760, %v4792_v41 }
 0x385   : > { %9265 = vrcp.f32 %v3312_v42  ;;  %v4812_v42 = vsub.f32 %v4810_v32, %v4811_v10  ;;  %v4794_v46 = vsub.f32 %v4792_v41, %v4793_v19 }
 0x387   : > { %8212 = vmatmul.mubr.f32.vlgmr.msra.gmra.mrb[8].mxu1 %v3389_v14  ;;  %v4323_v14 = vsub.f32 %v4321_v36, %v4322_v63  ;;  %v4813_v57 = vand.u32 4294901760, %v4812_v42  ;;  %v4795_v43 = vand.u32 4294901760, %v4794_v46 }
 0x388   : > { %8812 = vmatpush3.bf16.msra.mxu1 %v10425_v62  ;;  %8218 = vmatprep.mubr.msk.f32.mxu1 %vm9567_vm2, %v9568_v60  ;;  %v4339_v62 = vsub.f32 %v4251_v22, %v4257_v18  ;;  %v10611_v22 = vpack.c.bf16 %v5238_v47, %v5235_v45  ;;  %v10638_v47 = vpack.c.bf16 %v5708_v59, %v5705_v56 }
 0x389   : > { %8813 = vmatprep.subr.bf16.mxu1 %v9566_v0 }
 0x38a   : > { %v4340_v25 = vand.u32 4294901760, %v4339_v62 }
 0x38c   : > { %v4341_v31 = vsub.f32 %v4339_v62, %v4340_v25  ;;  %v8847_v27 = vpack.c.bf16 %v4340_v25, %v4333_v21 }
 0x38e   : > { %v4342_v2 = vand.u32 4294901760, %v4341_v31 }
 0x38f   : > { %v9266_v12 = vpop.eup %9265  ;;  %8219 = vmatmul.mubr.f32.vlgmr.msra.gmra.mrb[8].mxu1 %v3387_v16 }
 0x390   : > { %v3316_v38 = vmul.f32 %v9266_v12, %v9264_v54  ;;  %8815 = vmatpush3.bf16.msra.mxu1 %v10409_v9  ;;  %8225 = vmatprep.mubr.msk.f32.mxu1 %vm9567_vm2, %v9568_v60  ;;  %v4334_v9 = vsub.f32 %v4332_v15, %v4333_v21  ;;  %v4324_v54 = vand.u32 4294901760, %v4323_v14 }
 0x391   : > { %8834 = vmatprep.subr.bf16.mxu1 %v9566_v0 }
 0x392   : > { %v3780_v37 = vsel %vm2340_vm3, %v3316_v38, 0  ;;  %v4335_v52 = vand.u32 4294901760, %v4334_v9 }
 0x393   : > { %v10546_v23 = vand.u32 4294901760, %v3780_v37 }
 0x395   : > { %v3850_v28 = vsub.f32 %v3780_v37, %v10546_v23 }
 0x397   : > { %8226 = vmatmul.mubr.f32.vlgmr.msra.gmra.mrb[8].mxu1 %v3387_v16  ;;  %v3851_v30 = vand.u32 4294901760, %v3850_v28  ;;  %v8838_v16 = vpack.c.bf16 %v4342_v2, %v4335_v52 }
 0x398   : > { %8274 = vmatprep.mubr.msk.f32.mxu1 %vm9567_vm2, %v9568_v60 }
 0x399   : > { %8836 = vmatpush3.bf16.xpose.msra.mxu1 %v10549_v29  ;;  %v3852_v34 = vsub.f32 %v3850_v28, %v3851_v30 }
 0x39a   : > { %8837 = vmatprep.subr.bf16.mxu1 %v9566_v0 }
 0x39b   : > { %v3853_v61 = vand.u32 4294901760, %v3852_v34 }
 0x39d   : > { %8233 = vmatmul.mubr.f32.vlgmr.msra.gmra.mrb[12].mxu0 %v3853_v61 }
 0x39e   : > { %8821 = vmatpush3.bf16.msra.mxu0 %v10443_v35  ;;  %8239 = vmatprep.mubr.msk.f32.mxu0 %vm9567_vm2, %v9568_v60  ;;  %v8841_v35 = vpack.c.bf16 %v4339_v62, %v4332_v15 }
 0x39f   : > { %8822 = vmatprep.subr.bf16.mxu0 %v9566_v0 }
 0x3a0   : > { %8275 = vmatmul.mubr.f32.vlgmr.msra.gmra.mrb[10].mxu1 %v4324_v54 }
 0x3a1   : > { %8839 = vmatpush3.bf16.xpose.msra.mxu1 %v8838_v16  ;;  %8281 = vmatprep.mubr.msk.f32.mxu1 %vm9567_vm2, %v9568_v60 }
 0x3a2   : > { %8840 = vmatprep.subr.bf16.mxu1 %v9566_v0 }
 0x3a5   : > { %8240 = vmatmul.mubr.f32.vlgmr.msra.gmra.mrb[12].mxu0 %v10546_v23 }
 0x3a6   : > { %8824 = vmatpush3.bf16.msra.mxu0 %v8823_v33  ;;  %8246 = vmatprep.mubr.msk.f32.mxu0 %vm9567_vm2, %v9568_v60  ;;  %v4720_v33 = vsel %vm2340_vm3, %v10451_v39, 0 }
 0x3a7   : > { %8825 = vmatprep.subr.bf16.mxu0 %v9566_v0 }
 0x3a8   : > { %8282 = vmatmul.mubr.f32.vlgmr.msra.gmra.mrb[10].mxu1 %v10538_v20 }
 0x3a9   : > { %8842 = vmatpush3.bf16.xpose.msra.mxu1 %v8841_v35  ;;  %8288 = vmatprep.mubr.msk.f32.mxu1 %vm9567_vm2, %v9568_v60 }
 0x3aa   : > { %8843 = vmatprep.subr.bf16.mxu1 %v9566_v0 }
 0x3ad   : > { %8247 = vmatmul.mubr.f32.vlgmr.msra.gmra.mrb[12].mxu0 %v3850_v28 }
 0x3ae   : > { %8827 = vmatpush3.bf16.msra.mxu0 %v10421_v26  ;;  %8253 = vmatprep.mubr.msk.f32.mxu0 %vm9567_vm2, %v9568_v60 }
 0x3af   : > { %8828 = vmatprep.subr.bf16.mxu0 %v9566_v0 }
 0x3b0   : > { %8289 = vmatmul.mubr.f32.vlgmr.msra.gmra.mrb[10].mxu1 %v4321_v36 }
 0x3b1   : > { %8845 = vmatpush3.bf16.xpose.msra.mxu1 %v10549_v29  ;;  %8295 = vmatprep.mubr.msk.f32.mxu1 %vm9567_vm2, %v9568_v60 }
 0x3b2   : > { %8846 = vmatprep.subr.bf16.mxu1 %v9566_v0 }
 0x3b5   : > { %8254 = vmatmul.mubr.f32.vlgmr.msra.gmra.mrb[12].mxu0 %v3851_v30 }
 0x3b6   : > { %8830 = vmatpush3.bf16.msra.mxu0 %v10441_v1  ;;  %8260 = vmatprep.mubr.msk.f32.mxu0 %vm9567_vm2, %v9568_v60  ;;  %v4725_v1 = vand.u32 4294901760, %v4720_v33 }
 0x3b7   : > { %8831 = vmatprep.subr.bf16.mxu0 %v9566_v0 }
 0x3b8   : > { %8296 = vmatmul.mubr.f32.vlgmr.msra.gmra.mrb[10].mxu1 %v4322_v63  ;;  %v4803_v39 = vsub.f32 %v4720_v33, %v4725_v1 }
 0x3b9   : > { %8848 = vmatpush3.bf16.xpose.msra.mxu1 %v8847_v27  ;;  %8302 = vmatprep.mubr.msk.f32.mxu1 %vm9567_vm2, %v9568_v60 }
 0x3ba   : > { %8849 = vmatprep.subr.bf16.mxu1 %v9566_v0  ;;  %v4804_v17 = vand.u32 4294901760, %v4803_v39  ;;  %v8859_v44 = vpack.c.bf16 %v4810_v32, %v4803_v39 }
 0x3bc   : > { %v4805_v11 = vsub.f32 %v4803_v39, %v4804_v17  ;;  %v8865_v45 = vpack.c.bf16 %v4811_v10, %v4804_v17 }
 0x3bd   : > { %8261 = vmatmul.mubr.f32.vlgmr.msra.gmra.mrb[12].mxu0 %v10546_v23 }
 0x3be   : > { %8833 = vmatpush3.bf16.msra.mxu0 %v10421_v26  ;;  %8267 = vmatprep.mubr.msk.f32.mxu0 %vm9567_vm2, %v9568_v60  ;;  %v8853_v26 = vpack.c.bf16 %v4728_v6, %v4725_v1  ;;  %v4806_v18 = vand.u32 4294901760, %v4805_v11 }
 0x3bf   : > { %8852 = vmatprep.subr.bf16.mxu0 %v9566_v0 }
 0x3c0   : > { %8303 = vmatmul.mubr.f32.vlgmr.msra.gmra.mrb[10].mxu1 %v10538_v20  ;;  %v8856_v12 = vpack.c.bf16 %v4813_v57, %v4806_v18 }
 0x3c1   : > { %8851 = vmatpush3.bf16.xpose.msra.mxu1 %v10549_v29  ;;  %8309 = vmatprep.mubr.msk.f32.mxu1 %vm9567_vm2, %v9568_v60 }
 0x3c2   : > { %8870 = vmatprep.subr.bf16.mxu1 %v9566_v0 }
 0x3c5   : > { %8268 = vmatmul.mubr.f32.vlgmr.msra.gmra.mrb[12].mxu0 %v10546_v23 }
 0x3c6   : > { %8316 = vmatprep.mubr.msk.f32.mxu0 %vm9567_vm2, %v9568_v60 }
 0x3c7   : > { %8854 = vmatpush3.bf16.xpose.msra.mxu0 %v8853_v26 }
 0x3c8   : > { %8310 = vmatmul.mubr.f32.vlgmr.msra.gmra.mrb[10].mxu1 %v10538_v20  ;;  %8855 = vmatprep.subr.bf16.mxu0 %v9566_v0 }
 0x3c9   : > { %8872 = vmatpush3.bf16.msra.mxu1 %v10611_v22  ;;  %8358 = vmatprep.mubr.msk.f32.mxu1 %vm9567_vm2, %v9568_v60 }
 0x3ca   : > { %8873 = vmatprep.subr.bf16.mxu1 %v9566_v0 }
 0x3ce   : > { %8317 = vmatmul.mubr.f32.vlgmr.msra.gmra.mrb[14].mxu0 %v4795_v43 }
 0x3cf   : > { %8857 = vmatpush3.bf16.xpose.msra.mxu0 %v8856_v12  ;;  %8323 = vmatprep.mubr.msk.f32.mxu0 %vm9567_vm2, %v9568_v60 }
 0x3d0   : > { %8858 = vmatprep.subr.bf16.mxu0 %v9566_v0 }
 0x3d6   : > { %8324 = vmatmul.mubr.f32.vlgmr.msra.gmra.mrb[14].mxu0 %v4791_v40 }
 0x3d7   : > { %8860 = vmatpush3.bf16.xpose.msra.mxu0 %v8859_v44  ;;  %8330 = vmatprep.mubr.msk.f32.mxu0 %vm9567_vm2, %v9568_v60 }
 0x3d8   : > { %8861 = vmatprep.subr.bf16.mxu0 %v9566_v0 }
 0x3de   : > { %8331 = vmatmul.mubr.f32.vlgmr.msra.gmra.mrb[14].mxu0 %v4792_v41 }
 0x3df   : > { %8863 = vmatpush3.bf16.xpose.msra.mxu0 %v8853_v26  ;;  %8337 = vmatprep.mubr.msk.f32.mxu0 %vm9567_vm2, %v9568_v60 }
 0x3e0   : > { %8864 = vmatprep.subr.bf16.mxu0 %v9566_v0 }
 0x3e6   : > { %8338 = vmatmul.mubr.f32.vlgmr.msra.gmra.mrb[14].mxu0 %v4793_v19 }
 0x3e7   : > { %8866 = vmatpush3.bf16.xpose.msra.mxu0 %v8865_v45  ;;  %8344 = vmatprep.mubr.msk.f32.mxu0 %vm9567_vm2, %v9568_v60 }
 0x3e8   : > { %8867 = vmatprep.subr.bf16.mxu0 %v9566_v0 }
 0x3ee   : > { %8345 = vmatmul.mubr.f32.vlgmr.msra.gmra.mrb[14].mxu0 %v4791_v40 }
 0x3ef   : > { %8869 = vmatpush3.bf16.xpose.msra.mxu0 %v8853_v26  ;;  %8351 = vmatprep.mubr.msk.f32.mxu0 %vm9567_vm2, %v9568_v60 }
 0x3f0   : > { %8888 = vmatprep.subr.bf16.mxu0 %v9566_v0 }
 0x3f6   : > { %8352 = vmatmul.mubr.f32.vlgmr.msra.gmra.mrb[14].mxu0 %v4791_v40 }
 0x3f7   : > { %8890 = vmatpush3.bf16.msra.mxu0 %v10638_v47  ;;  %8400 = vmatprep.mubr.msk.f32.mxu0 %vm9567_vm2, %v9568_v60 }
 0x3f8   : > { %8891 = vmatprep.subr.bf16.mxu0 %v9566_v0 }
 0x46a   : > { %v10644_v20 = vpop.f32.mrb[8].mxu1 }
 0x46b   : > { %v8227_v15 = vpop.f32.mrb[9].mxu1 }
 0x498   : > { %v10646_v38 = vpop.f32.mrb[12].mxu0 }
 0x499   : > { %v8269_v62 = vpop.f32.mrb[13].mxu0 }
 0x49b   : > { %v4708_v36 = vpop.f32.mrb[10].mxu1 }
 0x49c   : > { %v5183_v50 = vmul.f32 0.25, %v4708_v36  ;;  %v8311_v37 = vpop.f32.mrb[11].mxu1 }
 0x49e   : > { %v5185_v51 = vsel %vm2340_vm3, %v5183_v50, -inf }
 0x49f   : > { %v5186_v56 = vrot.slane %v5185_v51, 4 }
 0x4a1   : > { %v5187_v59 = vmax.f32 %v5185_v51, %v5186_v56  ;;  %v2337_v56 = vld [vmem:[#allocation13 + $0x30] sm:$0xff] }
 0x4a3   : > { %v5188_v21 = vrot.slane %v5187_v59, 2 }
 0x4a5   : > { %v5189_v23 = vmax.f32 %v5187_v59, %v5188_v21  ;;  %v2338_v59 = vld [vmem:[#allocation13 + $0x38] sm:$0xff] }
 0x4a6   : > { %v6179_v21 = vand.u32 4294901760, %v2338_v59 }
 0x4a7   : > { %v5190_v25 = vrot.slane %v5189_v23, 1 }
 0x4a9   : > { %v5191_v28 = vmax.f32 %v5189_v23, %v5190_v25 }
 0x4ab   : > { %v5199_v63 = vsub.f32 %v5183_v50, %v5191_v28 }
 0x4ad   : > { %v5201_v29 = vmul.f32 1.442695, %v5199_v63 }
 0x4af   : > { %9267 = vpow2.f32 %v5201_v29  ;;  %v6281_v29 = vsub.f32 %v2338_v59, %v6179_v21 }
 0x4b9   : > { %v9268_v9 = vpop.eup %9267 }
 0x4ba   : > { %v5205_v30 = vsel %vm2340_vm3, %v9268_v9, 0.0 }
 0x4bb   : > { %v5206_v31 = vrot.slane %v5205_v30, 4 }
 0x4bd   : > { %v5207_v34 = vadd.f32 %v5206_v31, %v5205_v30 }
 0x4bf   : > { %v5208_v14 = vrot.slane %v5207_v34, 2 }
 0x4c1   : > { %v5209_v52 = vadd.f32 %v5208_v14, %v5207_v34  ;;  %v6282_v34 = vand.u32 4294901760, %v6281_v29 }
 0x4c3   : > { %v5210_v61 = vrot.slane %v5209_v52, 1 }
 0x4c5   : > { %v5211_v2 = vadd.f32 %v5210_v61, %v5209_v52  ;;  %v6283_v61 = vsub.f32 %v6281_v29, %v6282_v34 }
 0x4c7   : > { %9269 = vrcp.f32 %v5211_v2 }
 0x4c9   : > { %v5179_v54 = vpop.f32.mrb[14].mxu0 }
 0x4ca   : > { %v5184_v16 = vmul.f32 0.25, %v5179_v54  ;;  %v8353_v35 = vpop.f32.mrb[15].mxu0  ;;  %v6284_v54 = vand.u32 4294901760, %v6283_v61 }
 0x4cc   : > { %v5192_v24 = vsel %vm2340_vm3, %v5184_v16, -inf }
 0x4cd   : > { %v5193_v27 = vrot.slane %v5192_v24, 4 }
 0x4cf   : > { %v5194_v33 = vmax.f32 %v5192_v24, %v5193_v27 }
 0x4d1   : > { %v9270_v6 = vpop.eup %9269  ;;  %v5195_v7 = vrot.slane %v5194_v33, 2 }
 0x4d2   : > { %v5220_v1 = vmul.f32 %v9270_v6, %v9268_v9 }
 0x4d3   : > { %v5196_v40 = vmax.f32 %v5194_v33, %v5195_v7 }
 0x4d4   : > { %v5232_v32 = vsel %vm2340_vm3, %v5220_v1, 0 }
 0x4d5   : > { %v5197_v39 = vrot.slane %v5196_v40, 1  ;;  %v5301_v41 = vand.u32 4294901760, %v5232_v32 }
 0x4d7   : > { %v5198_v10 = vmax.f32 %v5196_v40, %v5197_v39  ;;  %v5302_v17 = vsub.f32 %v5232_v32, %v5301_v41 }
 0x4d9   : > { %v5200_v19 = vsub.f32 %v5184_v16, %v5198_v10  ;;  %v5303_v26 = vand.u32 4294901760, %v5302_v17 }
 0x4db   : > { %v5203_v42 = vmul.f32 1.442695, %v5200_v19  ;;  %v5304_v11 = vsub.f32 %v5302_v17, %v5303_v26 }
 0x4dd   : > { %9271 = vpow2.f32 %v5203_v42  ;;  %v5305_v46 = vand.u32 4294901760, %v5304_v11 }
 0x4df   : > { %8359 = vmatmul.mubr.f32.vlgmr.msra.gmra.mrb[12].mxu1 %v5305_v46 }
 0x4e0   : > { %8875 = vmatpush3.bf16.msra.mxu1 %v10502_v13  ;;  %8365 = vmatprep.mubr.msk.f32.mxu1 %vm9567_vm2, %v9568_v60 }
 0x4e1   : > { %8876 = vmatprep.subr.bf16.mxu1 %v9566_v0 }
 0x4e7   : > { %v9272_v57 = vpop.eup %9271  ;;  %8366 = vmatmul.mubr.f32.vlgmr.msra.gmra.mrb[12].mxu1 %v5301_v41 }
 0x4e8   : > { %v5212_v18 = vsel %vm2340_vm3, %v9272_v57, 0.0  ;;  %8878 = vmatpush3.bf16.msra.mxu1 %v8877_v55  ;;  %8372 = vmatprep.mubr.msk.f32.mxu1 %vm9567_vm2, %v9568_v60 }
 0x4e9   : > { %v5213_v43 = vrot.slane %v5212_v18, 4  ;;  %8879 = vmatprep.subr.bf16.mxu1 %v9566_v0 }
 0x4eb   : > { %v5214_v13 = vadd.f32 %v5213_v43, %v5212_v18  ;;  %v2331_v43 = vld [vmem:[#allocation13] sm:$0xff] }
 0x4ed   : > { %v5215_v12 = vrot.slane %v5214_v13, 2 }
 0x4ef   : > { %v5216_v44 = vadd.f32 %v5215_v12, %v5214_v13  ;;  %8373 = vmatmul.mubr.f32.vlgmr.msra.gmra.mrb[12].mxu1 %v5302_v17  ;;  %v2332_v13 = vld [vmem:[#allocation13 + $0x8] sm:$0xff]  ;;  %v6698_v12 = vsel %vm479_vm0, %v10644_v20, 0 }
 0x4f0   : > { %8881 = vmatpush3.bf16.msra.mxu1 %v10611_v22  ;;  %8379 = vmatprep.mubr.msk.f32.mxu1 %vm9567_vm2, %v9568_v60 }
 0x4f1   : > { %v5217_v45 = vrot.slane %v5216_v44, 1  ;;  %8882 = vmatprep.subr.bf16.mxu1 %v9566_v0 }
 0x4f3   : > { %v5218_v48 = vadd.f32 %v5217_v45, %v5216_v44  ;;  %v6704_v44 = vand.u32 4294901760, %v2331_v43  ;;  %v6707_v45 = vand.u32 4294901760, %v2332_v13 }
 0x4f5   : > { %9273 = vrcp.f32 %v5218_v48  ;;  %v10716_v48 = vand.u32 4294901760, %v6698_v12  ;;  %v6801_v20 = vsub.f32 %v2332_v13, %v6707_v45 }
 0x4f7   : > { %8380 = vmatmul.mubr.f32.vlgmr.msra.gmra.mrb[12].mxu1 %v5303_v26 }
 0x4f8   : > { %8884 = vmatpush3.bf16.msra.mxu1 %v10490_v4  ;;  %8386 = vmatprep.mubr.msk.f32.mxu1 %vm9567_vm2, %v9568_v60 }
 0x4f9   : > { %8885 = vmatprep.subr.bf16.mxu1 %v9566_v0 }
 0x4ff   : > { %v9274_v49 = vpop.eup %9273  ;;  %8387 = vmatmul.mubr.f32.vlgmr.msra.gmra.mrb[12].mxu1 %v5301_v41 }
 0x500   : > { %v5222_v55 = vmul.f32 %v9274_v49, %v9272_v57  ;;  %8887 = vmatpush3.bf16.msra.mxu1 %v10611_v22  ;;  %8393 = vmatprep.mubr.msk.f32.mxu1 %vm9567_vm2, %v9568_v60  ;;  %v2333_v49 = vld [vmem:[#allocation13 + $0x10] sm:$0xff] }
 0x502   : > { %v5702_v15 = vsel %vm2340_vm3, %v5222_v55, 0  ;;  %v2334_v55 = vld [vmem:[#allocation13 + $0x18] sm:$0xff] }
 0x503   : > { %v5771_v62 = vand.u32 4294901760, %v5702_v15 }
 0x505   : > { %v5772_v36 = vsub.f32 %v5702_v15, %v5771_v62  ;;  %v6701_v15 = vsel %vm479_vm0, %v10646_v38, 0 }
 0x507   : > { %8394 = vmatmul.mubr.f32.vlgmr.msra.gmra.mrb[12].mxu1 %v5301_v41  ;;  %v5773_v50 = vand.u32 4294901760, %v5772_v36 }
 0x509   : > { %v5774_v4 = vsub.f32 %v5772_v36, %v5773_v50 }
 0x50b   : > { %v5775_v37 = vand.u32 4294901760, %v5774_v4  ;;  %v6773_v4 = vsub.f32 %v6698_v12, %v10716_v48 }
 0x50d   : > { %8401 = vmatmul.mubr.f32.vlgmr.msra.gmra.mrb[16].mxu0 %v5775_v37  ;;  %v10721_v37 = vand.u32 4294901760, %v6701_v15 }
 0x50e   : > { %8893 = vmatpush3.bf16.msra.mxu0 %v10507_v8  ;;  %8407 = vmatprep.mubr.msk.f32.mxu0 %vm9567_vm2, %v9568_v60  ;;  %v6173_v8 = vand.u32 4294901760, %v2336_v5 }
 0x50f   : > { %8894 = vmatprep.subr.bf16.mxu0 %v9566_v0  ;;  %v6783_v38 = vsub.f32 %v6701_v15, %v10721_v37 }
 0x515   : > { %8408 = vmatmul.mubr.f32.vlgmr.msra.gmra.mrb[16].mxu0 %v5771_v62 }
 0x516   : > { %8896 = vmatpush3.bf16.msra.mxu0 %v8895_v53  ;;  %8414 = vmatprep.mubr.msk.f32.mxu0 %vm9567_vm2, %v9568_v60  ;;  %v6170_v53 = vand.u32 4294901760, %v2335_v3 }
 0x517   : > { %8897 = vmatprep.subr.bf16.mxu0 %v9566_v0 }
 0x518   : > { %v10696_v22 = vpack.c.bf16 %v6173_v8, %v6170_v53  ;;  %v6260_v51 = vsub.f32 %v2335_v3, %v6170_v53 }
 0x51a   : > { %8907 = vmatprep.subr.bf16.mxu1 %v10696_v22  ;;  %v6261_v23 = vand.u32 4294901760, %v6260_v51 }
 0x51b   : > { %8909 = vmatpush3.bf16.msra.mxu1 %v10696_v22 }
 0x51c   : > { %v6262_v25 = vsub.f32 %v6260_v51, %v6261_v23 }
 0x51d   : > { %8415 = vmatmul.mubr.f32.vlgmr.msra.gmra.mrb[16].mxu0 %v5772_v36  ;;  %v6713_v36 = vand.u32 4294901760, %v2334_v55 }
 0x51e   : > { %8899 = vmatpush3.bf16.msra.mxu0 %v10638_v47  ;;  %8421 = vmatprep.mubr.msk.f32.mxu0 %vm9567_vm2, %v9568_v60  ;;  %v6263_v9 = vand.u32 4294901760, %v6262_v25 }
 0x51f   : > { %8900 = vmatprep.subr.bf16.mxu0 %v9566_v0 }
 0x525   : > { %8422 = vmatmul.mubr.f32.vlgmr.msra.gmra.mrb[16].mxu0 %v5773_v50  ;;  %v6794_v50 = vsub.f32 %v2331_v43, %v6704_v44 }
 0x526   : > { %8902 = vmatpush3.bf16.msra.mxu0 %v10505_v58  ;;  %8428 = vmatprep.mubr.msk.f32.mxu0 %vm9567_vm2, %v9568_v60  ;;  %v6267_v58 = vsub.f32 %v2336_v5, %v6173_v8  ;;  %v6802_v5 = vand.u32 4294901760, %v6801_v20  ;;  %v6815_v8 = vsub.f32 %v2334_v55, %v6713_v36 }
 0x527   : > { %8903 = vmatprep.subr.bf16.mxu0 %v9566_v0  ;;  %v6176_v0 = vand.u32 4294901760, %v2337_v56  ;;  %v6795_v3 = vand.u32 4294901760, %v6794_v50  ;;  %v8970_v61 = vpack.c.bf16 %v6801_v20, %v6794_v50 }
 0x528   : > { %v8922_v35 = vpack.c.bf16 %v6267_v58, %v6260_v51  ;;  %v6774_v51 = vand.u32 4294901760, %v6773_v4  ;;  %v6803_v59 = vsub.f32 %v6801_v20, %v6802_v5 }
 0x529   : > { %v6274_v63 = vsub.f32 %v2337_v56, %v6176_v0  ;;  %v6796_v56 = vsub.f32 %v6794_v50, %v6795_v3 }
 0x52b   : > { %v6275_v31 = vand.u32 4294901760, %v6274_v63  ;;  %v8926_v24 = vpack.c.bf16 %v6281_v29, %v6274_v63 }
 0x52d   : > { %8429 = vmatmul.mubr.f32.vlgmr.msra.gmra.mrb[16].mxu0 %v5771_v62  ;;  %v6276_v52 = vsub.f32 %v6274_v63, %v6275_v31  ;;  %v8942_v33 = vpack.c.bf16 %v6282_v34, %v6275_v31  ;;  %v6804_v63 = vand.u32 4294901760, %v6803_v59 }
 0x52e   : > { %8905 = vmatpush3.bf16.msra.mxu0 %v10638_v47  ;;  %8435 = vmatprep.mubr.msk.f32.mxu0 %vm9567_vm2, %v9568_v60  ;;  %v6268_v47 = vand.u32 4294901760, %v6267_v58  ;;  %v10700_v60 = vpack.c.bf16 %v6179_v21, %v6176_v0  ;;  %v6816_v21 = vand.u32 4294901760, %v6815_v8 }
 0x52f   : > { %v6277_v2 = vand.u32 4294901760, %v6276_v52 }
 0x530   : > { %v6269_v28 = vsub.f32 %v6267_v58, %v6268_v47  ;;  %8911 = vmatprep.subr.bf16.mxu1 %v10700_v60  ;;  %v8938_v27 = vpack.c.bf16 %v6268_v47, %v6261_v23  ;;  %v8954_v58 = vpack.c.bf16 %v6707_v45, %v6704_v44  ;;  %v6775_v23 = vsub.f32 %v6773_v4, %v6774_v51 }
 0x531   : > { %8913 = vmatpush3.bf16.msra.mxu1 %v10700_v60  ;;  %v8918_v16 = vpack.c.bf16 %v6284_v54, %v6277_v2  ;;  %v6784_v47 = vand.u32 4294901760, %v6783_v38  ;;  %v8986_v54 = vpack.c.bf16 %v6802_v5, %v6795_v3 }
 0x532   : > { %v6270_v30 = vand.u32 4294901760, %v6269_v28  ;;  %v6797_v28 = vand.u32 4294901760, %v6796_v56 }
 0x534   : > { %v8914_v14 = vpack.c.bf16 %v6270_v30, %v6263_v9  ;;  %v6817_v9 = vsub.f32 %v6815_v8, %v6816_v21  ;;  %v6776_v30 = vand.u32 4294901760, %v6775_v23  ;;  %v8962_v31 = vpack.c.bf16 %v6804_v63, %v6797_v28 }
 0x535   : > { %8436 = vmatmul.mubr.f32.vlgmr.msra.gmra.mrb[16].mxu0 %v5771_v62  ;;  %v6710_v62 = vand.u32 4294901760, %v2333_v49 }
 0x536   : > { %8915 = vmatprep.subr.bf16.mxu1 %v8914_v14 }
 0x537   : > { %v6808_v53 = vsub.f32 %v2333_v49, %v6710_v62  ;;  %v8958_v25 = vpack.c.bf16 %v6713_v36, %v6710_v62 }
 0x539   : > { %v6809_v0 = vand.u32 4294901760, %v6808_v53  ;;  %v8974_v2 = vpack.c.bf16 %v6815_v8, %v6808_v53 }
 0x53b   : > { %v6810_v29 = vsub.f32 %v6808_v53, %v6809_v0 }
 0x53d   : > { %v6811_v34 = vand.u32 4294901760, %v6810_v29 }
 0x5da   : > { %v5689_v6 = vpop.f32.mrb[12].mxu1 }
 0x5db   : > { %v6164_v7 = vsel %vm479_vm0, %v5689_v6, 0  ;;  %v8395_v1 = vpop.f32.mrb[13].mxu1 }
 0x5dc   : > { %v6238_v40 = vand.u32 4294901760, %v6164_v7 }
 0x5de   : > { %v6239_v32 = vsub.f32 %v6164_v7, %v6238_v40 }
 0x5e0   : > { %v6240_v39 = vand.u32 4294901760, %v6239_v32 }
 0x5e2   : > { %v6241_v41 = vsub.f32 %v6239_v32, %v6240_v39 }
 0x5e4   : > { %v6242_v10 = vand.u32 4294901760, %v6241_v41 }
 0x5e6   : > { %8446 = vmatprep.mubr.f32.mxu1 %v6242_v10 }
 0x608   : > { %v6159_v17 = vpop.f32.mrb[16].mxu0 }
 0x609   : > { %v6167_v19 = vsel %vm479_vm0, %v6159_v17, 0  ;;  %v8437_v26 = vpop.f32.mrb[17].mxu0 }
 0x60a   : > { %v10706_v42 = vand.u32 4294901760, %v6167_v19 }
 0x60c   : > { %v6249_v11 = vsub.f32 %v6167_v19, %v10706_v42 }
 0x60e   : > { %v6250_v46 = vand.u32 4294901760, %v6249_v11 }
 0x610   : > { %v6251_v57 = vsub.f32 %v6249_v11, %v6250_v46 }
 0x612   : > { %v6252_v18 = vand.u32 4294901760, %v6251_v57 }
 0x614   : > { %8447 = vmatmul.mubr.f32.vlgmr.msra.gmra.mrb[14].mxu1 %v6252_v18 }
 0x615   : > { %8917 = vmatpush3.bf16.msra.mxu1 %v8914_v14  ;;  %8457 = vmatprep.mubr.f32.mxu1 %v6238_v40  ;;  %v6818_v14 = vand.u32 4294901760, %v6817_v9 }
 0x616   : > { %8919 = vmatprep.subr.bf16.mxu1 %v8918_v16 }
 0x619   : > { %8921 = vmatpush3.bf16.msra.mxu1 %v8918_v16  ;;  %v8990_v16 = vpack.c.bf16 %v6816_v21, %v6809_v0 }
 0x61a   : > { %8923 = vmatprep.subr.bf16.mxu1 %v8922_v35 }
 0x61c   : > { %8458 = vmatmul.mubr.f32.vlgmr.msra.gmra.mrb[14].mxu1 %v10706_v42 }
 0x61d   : > { %8925 = vmatpush3.bf16.msra.mxu1 %v8922_v35  ;;  %8468 = vmatprep.mubr.f32.mxu1 %v6239_v32  ;;  %v7436_v35 = vld [vmem:[%s10864_s27] ss:$0 sm:$0xff] }
 0x61e   : > { %8927 = vmatprep.subr.bf16.mxu1 %v8926_v24 }
 0x621   : > { %8929 = vmatpush3.bf16.msra.mxu1 %v8926_v24 }
 0x622   : > { %8931 = vmatprep.subr.bf16.mxu1 %v10696_v22 }
 0x624   : > { %8469 = vmatmul.mubr.f32.vlgmr.msra.gmra.mrb[14].mxu1 %v6249_v11 }
 0x625   : > { %8933 = vmatpush3.bf16.msra.mxu1 %v10696_v22  ;;  %8479 = vmatprep.mubr.f32.mxu1 %v6240_v39 }
 0x626   : > { %8935 = vmatprep.subr.bf16.mxu1 %v10700_v60 }
 0x629   : > { %8937 = vmatpush3.bf16.msra.mxu1 %v10700_v60 }
 0x62a   : > { %8939 = vmatprep.subr.bf16.mxu1 %v8938_v27 }
 0x62c   : > { %8480 = vmatmul.mubr.f32.vlgmr.msra.gmra.mrb[14].mxu1 %v6250_v46 }
 0x62d   : > { %8941 = vmatpush3.bf16.msra.mxu1 %v8938_v27  ;;  %8490 = vmatprep.mubr.f32.mxu1 %v6238_v40 }
 0x62e   : > { %8943 = vmatprep.subr.bf16.mxu1 %v8942_v33 }
 0x631   : > { %8945 = vmatpush3.bf16.msra.mxu1 %v8942_v33 }
 0x632   : > { %8947 = vmatprep.subr.bf16.mxu1 %v10696_v22 }
 0x634   : > { %8491 = vmatmul.mubr.f32.vlgmr.msra.gmra.mrb[14].mxu1 %v10706_v42 }
 0x635   : > { %8949 = vmatpush3.bf16.msra.mxu1 %v10696_v22  ;;  %8501 = vmatprep.mubr.f32.mxu1 %v6238_v40  ;;  %v6785_v22 = vsub.f32 %v6783_v38, %v6784_v47 }
 0x636   : > { %8951 = vmatprep.subr.bf16.mxu1 %v10700_v60 }
 0x637   : > { %v6786_v52 = vand.u32 4294901760, %v6785_v22 }
 0x639   : > { %8953 = vmatpush3.bf16.msra.mxu1 %v10700_v60  ;;  %v8966_v60 = vpack.c.bf16 %v6818_v14, %v6811_v34 }
 0x63a   : > { %8955 = vmatprep.subr.bf16.mxu1 %v8954_v58 }
 0x63c   : > { %8502 = vmatmul.mubr.f32.vlgmr.msra.gmra.mrb[14].mxu1 %v10706_v42 }
 0x63d   : > { %8957 = vmatpush3.bf16.msra.mxu1 %v8954_v58  ;;  %8512 = vmatprep.mubr.f32.mxu1 %v6776_v30 }
 0x63e   : > { %8959 = vmatprep.subr.bf16.mxu1 %v8958_v25 }
 0x641   : > { %8961 = vmatpush3.bf16.msra.mxu1 %v8958_v25 }
 0x642   : > { %8963 = vmatprep.subr.bf16.mxu1 %v8962_v31 }
 0x644   : > { %8513 = vmatmul.mubr.f32.vlgmr.msra.gmra.mrb[14].mxu1 %v6786_v52 }
 0x645   : > { %8965 = vmatpush3.bf16.msra.mxu1 %v8962_v31  ;;  %8523 = vmatprep.mubr.f32.mxu1 %v10716_v48 }
 0x646   : > { %8967 = vmatprep.subr.bf16.mxu1 %v8966_v60 }
 0x649   : > { %8969 = vmatpush3.bf16.msra.mxu1 %v8966_v60 }
 0x64a   : > { %8971 = vmatprep.subr.bf16.mxu1 %v8970_v61 }
 0x64c   : > { %8524 = vmatmul.mubr.f32.vlgmr.msra.gmra.mrb[14].mxu1 %v10721_v37 }
 0x64d   : > { %8973 = vmatpush3.bf16.msra.mxu1 %v8970_v61  ;;  %8534 = vmatprep.mubr.f32.mxu1 %v6773_v4 }
 0x64e   : > { %8975 = vmatprep.subr.bf16.mxu1 %v8974_v2 }
 0x651   : > { %8977 = vmatpush3.bf16.msra.mxu1 %v8974_v2 }
 0x652   : > { %8979 = vmatprep.subr.bf16.mxu1 %v8954_v58 }
 0x654   : > { %8535 = vmatmul.mubr.f32.vlgmr.msra.gmra.mrb[14].mxu1 %v6783_v38 }
 0x655   : > { %8981 = vmatpush3.bf16.msra.mxu1 %v8954_v58  ;;  %8545 = vmatprep.mubr.f32.mxu1 %v6774_v51 }
 0x656   : > { %8983 = vmatprep.subr.bf16.mxu1 %v8958_v25 }
 0x659   : > { %8985 = vmatpush3.bf16.msra.mxu1 %v8958_v25 }
 0x65a   : > { %8987 = vmatprep.subr.bf16.mxu1 %v8986_v54 }
 0x65c   : > { %8546 = vmatmul.mubr.f32.vlgmr.msra.gmra.mrb[14].mxu1 %v6784_v47 }
 0x65d   : > { %8989 = vmatpush3.bf16.msra.mxu1 %v8986_v54  ;;  %8556 = vmatprep.mubr.f32.mxu1 %v10716_v48 }
 0x65e   : > { %8991 = vmatprep.subr.bf16.mxu1 %v8990_v16 }
 0x661   : > { %8993 = vmatpush3.bf16.msra.mxu1 %v8990_v16 }
 0x662   : > { %8995 = vmatprep.subr.bf16.mxu1 %v8954_v58 }
 0x664   : > { %8557 = vmatmul.mubr.f32.vlgmr.msra.gmra.mrb[14].mxu1 %v10721_v37 }
 0x665   : > { %8997 = vmatpush3.bf16.msra.mxu1 %v8954_v58  ;;  %8567 = vmatprep.mubr.f32.mxu1 %v10716_v48 }
 0x666   : > { %8999 = vmatprep.subr.bf16.mxu1 %v8958_v25 }
 0x669   : > { %9001 = vmatpush3.bf16.msra.mxu1 %v8958_v25 }
 0x66c   : > { %8568 = vmatmul.mubr.f32.vlgmr.msra.gmra.mrb[14].mxu1 %v10721_v37 }
 0x73f   : > { %v8569_v24 = vpop.f32.mrb[14].mxu1 }
 0x740   : > { %v7238_v27 = vadd.f32 %v8569_v24, %v7436_v35  ;;  %v7221_v33 = vpop.f32.mrb[15].mxu1 }
 0x741   : > { %v7237_v6 = vadd.f32 %v7436_v35, %v7221_v33 }
 0x742   : > { %7240 = vst.msk [vmem:[%s460_s8 + $0x8] sm:$0xff] %vm1652_vm1, %v7238_v27 }
 0x743   : > { %7239 = vst.msk [vmem:[%s460_s8] sm:$0xff] %vm1652_vm1, %v7237_v6 }
 0x744   : > { %9490 = shalt.err (!%p9487_p12)
}
 0x745   : > { %s9491_s15 = scalar_lea.hbm %s10747_s21, 256  ;;  %s9495_s25 = scalar_lea.hbm %s10865_s26, 512 }
 0x746   : > { %p9492_p8 = scmp.ne.s32.totalorder %s10747_s21, %s9491_s15  ;;  %p9496_p1 = scmp.lt.u32.totalorder %s10747_s21, %s10865_s26 }
 0x747   : > { %p9497_p6 = scmp.lt.u32.totalorder %s9495_s25, %s9491_s15  ;;  %p9499_p5 = scmp.lt.u32.totalorder %s9491_s15, %s10747_s21 }
 0x748   : > { %p9493_p10 = pnand %p9492_p8, %p10866_p2 }
 0x749   : > { %p9498_p3 = por %p9497_p6, %p9496_p1 }
 0x74a   : > { %p9494_p4 = pneg %p9493_p10 }
 0x74b   : > { %p9500_p0 = por %p9499_p5, %p9498_p3 }
 0x74d   : > { %p9501_p11 = pnand %p9500_p0, %p9494_p4 }
 0x74f   : > { %9504 = shalt.err (!%p9501_p11)
}
 0x750   : > { %s9572_s11 = smov 128   ;;  %s9573_s12 = smov 8  }
 0x751   : > { %9175 = dma.vmem_to_hbm [thread:$0]  (%p10866_p2), %s10742_s18, 256, %s10747_s21, %s7242_s14, %s9572_s11, %s9572_s11, %s9573_s12  }
 0x752 PF: > { %s10867_s8 = sld [smem:[#allocation20_spill]]  ;;  %s10868_s16 = sld [smem:[#allocation22_spill]] }
 0x753   : > { %p10870_p7 = scmp.ge.s32.totalorder %s9555_s30, 2 }
 0x758   : > { %s7270_s3 = sand.u32 1, %s10867_s8   ;;  %p10869_p13 = scmp.ne.s32.totalorder %s10868_s16, 0 }
 0x759   : > { %s7271_s27 = scalar_lea.sflag [#allocation4], %s7270_s3 }
 0x75a   : > { %p9201_p9 = pnand %p10870_p7, %p10869_p13 }
 0x75c   : > { %9538 = dma.done.wait (!%p9201_p9), %s7271_s27, 256  }
 0x75d   : > { %9540 = vsyncadd (!%p9201_p9), %s7271_s27, 4294967040  ;;  %s10871_s30 = sld [smem:[#allocation23_spill]]  ;;  %s10872_s1 = sld [smem:[#allocation21_spill]] }
 0x75e   : > { %s10873_s29 = sld [smem:[#allocation25_spill]]  ;;  %s10874_s27 = smov %s9547_s28 }
 0x763   : > { %p26_p12 = scmp.ge.s32.totalorder %s10871_s30, 4   ;;  %s10875_s28 = smov %s10872_s1 }
 0x765   :  { %28 = sbr.rel (!%p26_p12) target bundleno = 15 (0xf), region = 137 }
 0x76c   :  { %7276 = vsyncpa [#allocation3], 1 }
 0x76d   :  { %7278 = vsyncpa [#allocation3 + $0x1], 1 }
 0x76e   :  { %7279 = vsyncpa [#allocation6], 1 }
 0x76f   :  { %7281 = vsyncpa [#allocation6 + $0x1], 1 }
 0x770   :  { %7282 = vsyncpa [#allocation9], 1 }
 0x771   :  { %7283 = vsyncpa [#allocation12], 1 }
 0x772   :  { %7284 = vsyncpa [#allocation4], 1 }
 0x773   :  { %7286 = vsyncpa [#allocation4 + $0x1], 1 }

</bundles_post_ra>
